<compile_context>
chip_gen: v7x
topology: tpu7x:2x2x1
jax: 0.10.0
libtpu: 0.0.40
codegen_flags: <defaults>
</compile_context>

<pallas_src>
import functools

import jax
import jax.numpy as jnp
from jax import lax
from jax.experimental import pallas as pl
from jax.experimental.pallas import tpu as pltpu

BN_EPS = 1e-5


# --------------------------------- kernel ------------------------------------

def cim_kernel(x12_ref, xx_ref, wr_ref, wp_ref, wf1_ref, wf2_ref,
               pv2_ref, pv1_ref, out_ref, cols_ref, *, L):
    """CIM forward on batch-flattened (channels, N*L) slabs.

    x12_ref : (2*in_dim, N*L) bf16   stacked [x1; x2]
    xx_ref  : (C//2,     N*L) f32
    wr_ref  : (2*C, 2*in_dim) bf16   block-diag 1x1 weights [reduc_1 0; 0 reduc_2]
    wp_ref  : (2, 2*C, 6*C)   bf16   paired im2col k=3 weights:
              [0] layer_20/layer_10 (output rows pre-swapped -> gate=[dep_w; rgb_w])
              [1] layer_11/layer_21
    wf1_ref : (C, 6*C)        bf16   layer_ful1 im2col weight (cat is implicit)
    wf2_ref : (C, 3*(C+C//2)) bf16   layer_ful2 im2col weight (cat is implicit)
    pv2_ref : (2*C, 4) f32  cols: [b_r1|b_r2], [b20|b10], [g11|g21], [be11|be21]
    pv1_ref : (C, 4)   f32  cols: gf1, bef1, gf2, bef2
    out_ref : (C, N*L) f32
    cols_ref: (6*C, N*L) bf16 scratch, reused by every k=3 conv's im2col slab
    """
    NL = out_ref.shape[1]
    inv_n = 1.0 / NL

    # Edge masks (sequence edges == batch boundaries after flattening), built once
    # as f32 multiplicands.
    lane = lax.broadcasted_iota(jnp.int32, (1, NL), 1)
    mlf = ((lane % L) != 0).astype(jnp.float32)        # left tap (x[l-1]) valid
    mrf = ((lane % L) != (L - 1)).astype(jnp.float32)  # right tap (x[l+1]) valid

    pv2 = pv2_ref[...]
    pv1 = pv1_ref[...]

    def fill_cols(parts):
        """Write tap-major bf16 im2col cols of the (virtually) stacked `parts`
        into the persistent scratch; returns the contraction length 3*sum(Cin)."""
        total = sum(int(p.shape[0]) for p in parts)
        off = 0
        for p in parts:
            cin = int(p.shape[0])
            cols_ref[off:off + cin, :] = (
                pltpu.roll(p, 1, axis=1) * mlf).astype(jnp.bfloat16)          # x[l-1]
            cols_ref[total + off:total + off + cin, :] = p.astype(jnp.bfloat16)
            cols_ref[2 * total + off:2 * total + off + cin, :] = (
                pltpu.roll(p, NL - 1, axis=1) * mrf).astype(jnp.bfloat16)     # x[l+1]
            off += cin
        return 3 * total

    def conv3(parts, w):
        """k=3, pad=1 Conv1d (of the channel-concatenation of `parts`) as one
        bf16 im2col MXU matmul with f32 accumulation."""
        k = fill_cols(parts)
        return jnp.dot(w, cols_ref[0:k, :], preferred_element_type=jnp.float32)

    def bn_relu(y, g, b):
        """Training-mode BatchNorm1d + ReLU, two-pass (centered) variance."""
        m = jnp.sum(y, axis=1, keepdims=True) * inv_n
        d = y - m
        var = jnp.sum(d * d, axis=1, keepdims=True) * inv_n     # biased variance
        return jnp.maximum(d * (g * lax.rsqrt(var + BN_EPS)) + b, 0.0)

    # reduc_1 / reduc_2 : paired block-diag 1x1 conv + bias + ReLU -> [x_rgb; x_dep]
    xr_xd = jnp.maximum(
        jnp.dot(wr_ref[...], x12_ref[...], preferred_element_type=jnp.float32)
        + pv2[:, 0:1], 0.0)

    # layer_10 / layer_20 paired (output rows swapped in the weight) + sigmoid.
    # gate = [dep_w; rgb_w], so cross-gating + residual is one multiply.
    gate = jax.nn.sigmoid(conv3([xr_xd], wp_ref[0]) + pv2[:, 1:2])
    xpair_r = xr_xd * (gate + 1.0)

    # layer_11 / layer_21 paired : conv -> BN -> ReLU (conv bias cancelled by BN)
    pair_b = bn_relu(conv3([xpair_r], wp_ref[1]), pv2[:, 2:3], pv2[:, 3:4])

    # layer_ful1 : conv(cat([x_rgb_b, x_dep_b])) — pair_b IS the concat already.
    out1 = bn_relu(conv3([pair_b], wf1_ref[...]), pv1[:, 0:1], pv1[:, 1:2])

    # layer_ful2 : conv(cat([out1, xx])) — one K = 3*(C + C//2) matmul.
    out2 = bn_relu(conv3([out1, xx_ref[...]], wf2_ref[...]), pv1[:, 2:3], pv1[:, 3:4])

    out_ref[...] = out2


# --------------------------------- wrapper -----------------------------------

def cim_forward(x1, x2, xx, p):
    N, in_dim, L = x1.shape
    C = p['w10'].shape[0]
    NL = N * L
    f32, bf16 = jnp.float32, jnp.bfloat16

    def flat(x, dtype):   # (N, Cin, L) -> (Cin, N*L), batch flattened into lanes
        return jnp.transpose(x, (1, 0, 2)).reshape(x.shape[1], NL).astype(dtype)

    def wflat3(w):        # (O, Cin, 3) torch layout -> (O, 3*Cin) tap-major
        return jnp.concatenate([w[:, :, 0], w[:, :, 1], w[:, :, 2]], axis=1)

    def pair_blockdiag(w_a, w_b, swap_out=False):
        """Block-diag weight for a paired k=3 conv on stacked [a; b] channels.
        Output rows 0:C apply w_a to the a-taps, rows C:2C apply w_b to the
        b-taps; swap_out=True exchanges the output row blocks."""
        z = jnp.zeros_like(w_a)
        ra = wflat3(jnp.concatenate([w_a, z], axis=1))
        rb = wflat3(jnp.concatenate([z, w_b], axis=1))
        return jnp.concatenate([rb, ra] if swap_out else [ra, rb], axis=0)

    # Inputs (matmul-only operands go in as bf16).
    x12 = jnp.concatenate([flat(x1, bf16), flat(x2, bf16)], axis=0)   # (2*in_dim, NL)
    xxf = flat(xx, f32)                                               # (C//2, NL)

    # Weights.
    zr = jnp.zeros_like(p['w_r1'][:, :, 0])
    wr = jnp.concatenate([
        jnp.concatenate([p['w_r1'][:, :, 0], zr], axis=1),
        jnp.concatenate([zr, p['w_r2'][:, :, 0]], axis=1)], axis=0).astype(bf16)
    wp = jnp.stack([
        pair_blockdiag(p['w10'], p['w20'], swap_out=True),   # gate = [dep_w; rgb_w]
        pair_blockdiag(p['w11'], p['w21'], swap_out=False),
    ], axis=0).astype(bf16)                                           # (2, 2C, 6C)
    wf1 = wflat3(p['wf1']).astype(bf16)                               # (C, 6C)
    wf2 = wflat3(p['wf2']).astype(bf16)                               # (C, 3*(C+C//2))

    # Per-channel vectors. Biases of layer_11/21, ful1, ful2 are dropped (BN cancels).
    pv2 = jnp.stack([
        jnp.concatenate([p['b_r1'], p['b_r2']]),
        jnp.concatenate([p['b20'], p['b10']]),      # swapped to match gate weight
        jnp.concatenate([p['g11'], p['g21']]),
        jnp.concatenate([p['be11'], p['be21']]),
    ], axis=1).astype(f32)                                            # (2C, 4)
    pv1 = jnp.stack([p['gf1'], p['bef1'], p['gf2'], p['bef2']], axis=1).astype(f32)

    args = (x12, xxf, wr, wp, wf1, wf2, pv2, pv1)

    # Scoped-VMEM limit per generation (~48 MiB on v7x, 96 MiB on v5e/v6e).
    try:
        vmem_cap = int(pltpu.get_tpu_info().vmem_capacity_bytes)
    except Exception:
        vmem_cap = 128 * 1024 * 1024
    vmem_limit = min(96 * 1024 * 1024, (vmem_cap * 3) // 4)

    flops = 2 * NL * (2 * C * 2 * in_dim + 2 * (2 * C * 6 * C)
                      + C * 6 * C + C * 3 * (C + C // 2)) + 24 * C * NL
    transcendentals = 2 * C * NL + 8 * C
    bytes_accessed = (sum(int(a.size) * a.dtype.itemsize for a in args)
                      + 4 * C * NL)

    out_flat = pl.pallas_call(
        functools.partial(cim_kernel, L=L),
        out_shape=jax.ShapeDtypeStruct((C, NL), jnp.float32),
        in_specs=[pl.BlockSpec(memory_space=pltpu.MemorySpace.VMEM)] * len(args),
        out_specs=pl.BlockSpec(memory_space=pltpu.MemorySpace.VMEM),
        scratch_shapes=[pltpu.VMEM((6 * C, NL), jnp.bfloat16)],
        compiler_params=pltpu.CompilerParams(vmem_limit_bytes=vmem_limit),
        cost_estimate=pl.CostEstimate(flops=flops,
                                      transcendentals=transcendentals,
                                      bytes_accessed=bytes_accessed),
    )(*args)

    # (C, N*L) lane-dense kernel output -> (N, C, L)
    return jnp.transpose(out_flat.reshape(C, N, L), (1, 0, 2))


# ----------------------- deterministic parameter init ------------------------

def init_params(key, in_dim, out_dim):
    C = out_dim

    def conv_init(k, O, Cin, K):
        k1, k2 = jax.random.split(k)
        bound = 1.0 / (Cin * K) ** 0.5          # PyTorch Conv1d default init
        w = jax.random.uniform(k1, (O, Cin, K), jnp.float32, -bound, bound)
        b = jax.random.uniform(k2, (O,), jnp.float32, -bound, bound)
        return w, b

    ks = jax.random.split(key, 8)
    p = {}
    p['w_r1'], p['b_r1'] = conv_init(ks[0], C, in_dim, 1)
    p['w_r2'], p['b_r2'] = conv_init(ks[1], C, in_dim, 1)
    p['w10'], p['b10'] = conv_init(ks[2], C, C, 3)
    p['w20'], p['b20'] = conv_init(ks[3], C, C, 3)
    p['w11'], p['b11'] = conv_init(ks[4], C, C, 3)
    p['g11'], p['be11'] = jnp.ones((C,), jnp.float32), jnp.zeros((C,), jnp.float32)
    p['w21'], p['b21'] = conv_init(ks[5], C, C, 3)
    p['g21'], p['be21'] = jnp.ones((C,), jnp.float32), jnp.zeros((C,), jnp.float32)
    p['wf1'], p['bf1'] = conv_init(ks[6], C, 2 * C, 3)
    p['gf1'], p['bef1'] = jnp.ones((C,), jnp.float32), jnp.zeros((C,), jnp.float32)
    p['wf2'], p['bf2'] = conv_init(ks[7], C, C + C // 2, 3)
    p['gf2'], p['bef2'] = jnp.ones((C,), jnp.float32), jnp.zeros((C,), jnp.float32)
    return p


# --------------------------- pure-JAX reference -------------------------------

def ref_forward(x1, x2, xx, p):
    def conv(x, w, b, pad):
        y = lax.conv_general_dilated(x, w, window_strides=(1,),
                                     padding=((pad, pad),),
                                     dimension_numbers=('NCH', 'OIH', 'NCH'))
        return y + b[None, :, None]

    def bn_relu(y, g, b):
        m = jnp.mean(y, axis=(0, 2), keepdims=True)
        v = jnp.mean((y - m) ** 2, axis=(0, 2), keepdims=True)
        yn = (y - m) * lax.rsqrt(v + BN_EPS)
        return jnp.maximum(yn * g[None, :, None] + b[None, :, None], 0.0)

    x_rgb = jnp.maximum(conv(x1, p['w_r1'], p['b_r1'], 0), 0.0)
    x_dep = jnp.maximum(conv(x2, p['w_r2'], p['b_r2'], 0), 0.0)
    rgb_w = jax.nn.sigmoid(conv(x_rgb, p['w10'], p['b10'], 1))
    dep_w = jax.nn.sigmoid(conv(x_dep, p['w20'], p['b20'], 1))
    x_rgb_r = x_rgb * dep_w + x_rgb
    x_dep_r = x_dep * rgb_w + x_dep
    x_rgb_r = bn_relu(conv(x_rgb_r, p['w11'], p['b11'], 1), p['g11'], p['be11'])
    x_dep_r = bn_relu(conv(x_dep_r, p['w21'], p['b21'], 1), p['g21'], p['be21'])
    ful = jnp.concatenate([x_rgb_r, x_dep_r], axis=1)
    out1 = bn_relu(conv(ful, p['wf1'], p['bf1'], 1), p['gf1'], p['bef1'])
    ful2 = jnp.concatenate([out1, xx], axis=1)
    return bn_relu(conv(ful2, p['wf2'], p['bf2'], 1), p['gf2'], p['bef2'])


# ----------------------------------- main -------------------------------------

if __name__ == "__main__":
    N, IN_DIM, OUT_DIM, L = 2, 64, 32, 64        # N*L = 128 -> lane-dense slabs
    key = jax.random.PRNGKey(0)
    k1, k2, k3, kp = jax.random.split(key, 4)

    x1 = jax.random.normal(k1, (N, IN_DIM, L), jnp.float32)
    x2 = jax.random.normal(k2, (N, IN_DIM, L), jnp.float32)
    xx = jax.random.normal(k3, (N, OUT_DIM // 2, L), jnp.float32)
    params = init_params(kp, IN_DIM, OUT_DIM)

    out = jax.block_until_ready(cim_forward(x1, x2, xx, params))
    ref = jax.block_until_ready(ref_forward(x1, x2, xx, params))

    assert out.shape == (N, OUT_DIM, L)
    # bf16 MXU operands with f32 accumulation -> looser tolerance than pure-f32.
    max_diff = jnp.max(jnp.abs(out - ref))
    assert jnp.allclose(out, ref, atol=5e-2, rtol=5e-2), f"max abs diff {max_diff}"
    print("KERNEL_OK")
</pallas_src>

<mosaic_0001>
module attributes {stable_mosaic.version = 11 : i64} {
  func.func @cim_kernel(%arg0: memref<128x128xbf16, #tpu.memory_space<vmem>>, %arg1: memref<16x128xf32, #tpu.memory_space<vmem>>, %arg2: memref<64x128xbf16, #tpu.memory_space<vmem>>, %arg3: memref<2x64x192xbf16, #tpu.memory_space<vmem>>, %arg4: memref<32x192xbf16, #tpu.memory_space<vmem>>, %arg5: memref<32x144xbf16, #tpu.memory_space<vmem>>, %arg6: memref<64x4xf32, #tpu.memory_space<vmem>>, %arg7: memref<32x4xf32, #tpu.memory_space<vmem>>, %arg8: memref<32x128xf32, #tpu.memory_space<vmem>>, %arg9: memref<192x128xbf16, #tpu.memory_space<vmem>>) attributes {dimension_semantics = [], scalar_prefetch = 0 : i64, scratch_operands = 1 : i64, tpu.core_type = #tpu.core_type<tc>} {
    %0 = tpu.iota {dimensions = array<i32: 1>} : vector<1x128xi32>
    %c64_i32 = arith.constant 64 : i32
    %c0_i32 = arith.constant 0 : i32
    %1 = arith.cmpi eq, %c64_i32, %c0_i32 : i32
    %c1_i32 = arith.constant 1 : i32
    %2 = arith.select %1, %c1_i32, %c64_i32 : i32
    %3 = vector.broadcast %2 : i32 to vector<1x128xi32>
    %4 = arith.remsi %0, %3 : vector<1x128xi32>
    %c0_i32_0 = arith.constant 0 : i32
    %5 = vector.broadcast %c0_i32_0 : i32 to vector<1x128xi32>
    %6 = arith.cmpi ne, %4, %5 : vector<1x128xi32>
    %c0_i32_1 = arith.constant 0 : i32
    %7 = vector.broadcast %c0_i32_1 : i32 to vector<1x128xi32>
    %8 = arith.cmpi slt, %4, %7 : vector<1x128xi32>
    %c0_i32_2 = arith.constant 0 : i32
    %9 = arith.cmpi slt, %2, %c0_i32_2 : i32
    %10 = vector.broadcast %9 : i1 to vector<1x128xi1>
    %11 = vector.broadcast %10 : vector<1x128xi1> to vector<1x128xi1>
    %12 = arith.xori %8, %11 : vector<1x128xi1>
    %13 = arith.andi %12, %6 : vector<1x128xi1>
    %14 = vector.broadcast %2 : i32 to vector<1x128xi32>
    %15 = arith.addi %4, %14 : vector<1x128xi32>
    %16 = arith.select %13, %15, %4 : vector<1x128xi1>, vector<1x128xi32>
    %c0_i32_3 = arith.constant 0 : i32
    %17 = vector.broadcast %c0_i32_3 : i32 to vector<1x128xi32>
    %18 = arith.cmpi ne, %16, %17 : vector<1x128xi32>
    %19 = arith.extui %18 : vector<1x128xi1> to vector<1x128xi32>
    %20 = arith.sitofp %19 : vector<1x128xi32> to vector<1x128xf32>
    %c64_i32_4 = arith.constant 64 : i32
    %c0_i32_5 = arith.constant 0 : i32
    %21 = arith.cmpi eq, %c64_i32_4, %c0_i32_5 : i32
    %c1_i32_6 = arith.constant 1 : i32
    %22 = arith.select %21, %c1_i32_6, %c64_i32_4 : i32
    %23 = vector.broadcast %22 : i32 to vector<1x128xi32>
    %24 = arith.remsi %0, %23 : vector<1x128xi32>
    %c0_i32_7 = arith.constant 0 : i32
    %25 = vector.broadcast %c0_i32_7 : i32 to vector<1x128xi32>
    %26 = arith.cmpi ne, %24, %25 : vector<1x128xi32>
    %c0_i32_8 = arith.constant 0 : i32
    %27 = vector.broadcast %c0_i32_8 : i32 to vector<1x128xi32>
    %28 = arith.cmpi slt, %24, %27 : vector<1x128xi32>
    %c0_i32_9 = arith.constant 0 : i32
    %29 = arith.cmpi slt, %22, %c0_i32_9 : i32
    %30 = vector.broadcast %29 : i1 to vector<1x128xi1>
    %31 = vector.broadcast %30 : vector<1x128xi1> to vector<1x128xi1>
    %32 = arith.xori %28, %31 : vector<1x128xi1>
    %33 = arith.andi %32, %26 : vector<1x128xi1>
    %34 = vector.broadcast %22 : i32 to vector<1x128xi32>
    %35 = arith.addi %24, %34 : vector<1x128xi32>
    %36 = arith.select %33, %35, %24 : vector<1x128xi1>, vector<1x128xi32>
    %c63_i32 = arith.constant 63 : i32
    %37 = vector.broadcast %c63_i32 : i32 to vector<1x128xi32>
    %38 = arith.cmpi ne, %36, %37 : vector<1x128xi32>
    %39 = arith.extui %38 : vector<1x128xi1> to vector<1x128xi32>
    %40 = arith.sitofp %39 : vector<1x128xi32> to vector<1x128xf32>
    %c0 = arith.constant 0 : index
    %c0_10 = arith.constant 0 : index
    %41 = vector.load %arg6[%c0, %c0_10] : memref<64x4xf32, #tpu.memory_space<vmem>>, vector<64x4xf32>
    %c0_11 = arith.constant 0 : index
    %c0_12 = arith.constant 0 : index
    %42 = vector.load %arg7[%c0_11, %c0_12] : memref<32x4xf32, #tpu.memory_space<vmem>>, vector<32x4xf32>
    %c0_13 = arith.constant 0 : index
    %c0_14 = arith.constant 0 : index
    %43 = vector.load %arg2[%c0_13, %c0_14] : memref<64x128xbf16, #tpu.memory_space<vmem>>, vector<64x128xbf16>
    %c0_15 = arith.constant 0 : index
    %c0_16 = arith.constant 0 : index
    %44 = vector.load %arg0[%c0_15, %c0_16] : memref<128x128xbf16, #tpu.memory_space<vmem>>, vector<128x128xbf16>
    %cst = arith.constant dense<0.000000e+00> : vector<64x128xf32>
    %45 = tpu.matmul %43, %44, %cst {dimension_numbers = #tpu.dot_dimension_numbers<[1], [0], [0], [1], [0, 0, 1, 1], [], []>} : vector<64x128xbf16>, vector<128x128xbf16>, vector<64x128xf32> -> vector<64x128xf32>
    %46 = vector.extract_strided_slice %41 {offsets = [0, 0], sizes = [64, 1], strides = [1, 1]} : vector<64x4xf32> to vector<64x1xf32>
    %47 = vector.broadcast %46 : vector<64x1xf32> to vector<64x128xf32>
    %48 = arith.addf %45, %47 : vector<64x128xf32>
    %cst_17 = arith.constant 0.000000e+00 : f32
    %49 = vector.broadcast %cst_17 : f32 to vector<64x128xf32>
    %50 = arith.maximumf %48, %49 : vector<64x128xf32>
    %c0_18 = arith.constant 0 : index
    %c0_19 = arith.constant 0 : index
    %c0_20 = arith.constant 0 : index
    %51 = vector.load %arg3[%c0_18, %c0_19, %c0_20] : memref<2x64x192xbf16, #tpu.memory_space<vmem>>, vector<1x64x192xbf16>
    %52 = vector.shape_cast %51 : vector<1x64x192xbf16> to vector<64x192xbf16>
    %c1_i32_21 = arith.constant 1 : i32
    %53 = tpu.dynamic_rotate %50 by %c1_i32_21 dim 1 : vector<64x128xf32>, i32 -> vector<64x128xf32>
    %54 = vector.broadcast %20 : vector<1x128xf32> to vector<64x128xf32>
    %55 = arith.mulf %53, %54 : vector<64x128xf32>
    %56 = arith.truncf %55 : vector<64x128xf32> to vector<64x128xbf16>
    %c0_22 = arith.constant 0 : index
    %c0_23 = arith.constant 0 : index
    %57 = vector.load %arg9[%c0_22, %c0_23] : memref<192x128xbf16, #tpu.memory_space<vmem>>, vector<64x128xbf16>
    tpu.vector_store %arg9[%c0_22, %c0_23], %56 {strides = array<i32>} : memref<192x128xbf16, #tpu.memory_space<vmem>>, vector<64x128xbf16>,
    %58 = arith.truncf %50 : vector<64x128xf32> to vector<64x128xbf16>
    %c64 = arith.constant 64 : index
    %c0_24 = arith.constant 0 : index
    %59 = vector.load %arg9[%c64, %c0_24] : memref<192x128xbf16, #tpu.memory_space<vmem>>, vector<64x128xbf16>
    tpu.vector_store %arg9[%c64, %c0_24], %58 {strides = array<i32>} : memref<192x128xbf16, #tpu.memory_space<vmem>>, vector<64x128xbf16>,
    %c127_i32 = arith.constant 127 : i32
    %60 = tpu.dynamic_rotate %50 by %c127_i32 dim 1 : vector<64x128xf32>, i32 -> vector<64x128xf32>
    %61 = vector.broadcast %40 : vector<1x128xf32> to vector<64x128xf32>
    %62 = arith.mulf %60, %61 : vector<64x128xf32>
    %63 = arith.truncf %62 : vector<64x128xf32> to vector<64x128xbf16>
    %c128 = arith.constant 128 : index
    %c0_25 = arith.constant 0 : index
    %64 = vector.load %arg9[%c128, %c0_25] : memref<192x128xbf16, #tpu.memory_space<vmem>>, vector<64x128xbf16>
    tpu.vector_store %arg9[%c128, %c0_25], %63 {strides = array<i32>} : memref<192x128xbf16, #tpu.memory_space<vmem>>, vector<64x128xbf16>,
    %c0_26 = arith.constant 0 : index
    %c0_27 = arith.constant 0 : index
    %65 = vector.load %arg9[%c0_26, %c0_27] : memref<192x128xbf16, #tpu.memory_space<vmem>>, vector<192x128xbf16>
    %cst_28 = arith.constant dense<0.000000e+00> : vector<64x128xf32>
    %66 = tpu.matmul %52, %65, %cst_28 {dimension_numbers = #tpu.dot_dimension_numbers<[1], [0], [0], [1], [0, 0, 1, 1], [], []>} : vector<64x192xbf16>, vector<192x128xbf16>, vector<64x128xf32> -> vector<64x128xf32>
    %67 = vector.extract_strided_slice %41 {offsets = [0, 1], sizes = [64, 1], strides = [1, 1]} : vector<64x4xf32> to vector<64x1xf32>
    %68 = vector.broadcast %67 : vector<64x1xf32> to vector<64x128xf32>
    %69 = arith.addf %66, %68 : vector<64x128xf32>
    %70 = arith.negf %69 : vector<64x128xf32>
    %71 = math.exp %70 : vector<64x128xf32>
    %cst_29 = arith.constant 1.000000e+00 : f32
    %72 = vector.broadcast %cst_29 : f32 to vector<64x128xf32>
    %73 = arith.addf %72, %71 : vector<64x128xf32>
    %74 = arith.divf %72, %73 : vector<64x128xf32>
    %cst_30 = arith.constant 1.000000e+00 : f32
    %75 = vector.broadcast %cst_30 : f32 to vector<64x128xf32>
    %76 = arith.addf %74, %75 : vector<64x128xf32>
    %77 = arith.mulf %50, %76 : vector<64x128xf32>
    %c1 = arith.constant 1 : index
    %c0_31 = arith.constant 0 : index
    %c0_32 = arith.constant 0 : index
    %78 = vector.load %arg3[%c1, %c0_31, %c0_32] : memref<2x64x192xbf16, #tpu.memory_space<vmem>>, vector<1x64x192xbf16>
    %79 = vector.shape_cast %78 : vector<1x64x192xbf16> to vector<64x192xbf16>
    %c1_i32_33 = arith.constant 1 : i32
    %80 = tpu.dynamic_rotate %77 by %c1_i32_33 dim 1 : vector<64x128xf32>, i32 -> vector<64x128xf32>
    %81 = vector.broadcast %20 : vector<1x128xf32> to vector<64x128xf32>
    %82 = arith.mulf %80, %81 : vector<64x128xf32>
    %83 = arith.truncf %82 : vector<64x128xf32> to vector<64x128xbf16>
    %c0_34 = arith.constant 0 : index
    %c0_35 = arith.constant 0 : index
    %84 = vector.load %arg9[%c0_34, %c0_35] : memref<192x128xbf16, #tpu.memory_space<vmem>>, vector<64x128xbf16>
    tpu.vector_store %arg9[%c0_34, %c0_35], %83 {strides = array<i32>} : memref<192x128xbf16, #tpu.memory_space<vmem>>, vector<64x128xbf16>,
    %85 = arith.truncf %77 : vector<64x128xf32> to vector<64x128xbf16>
    %c64_36 = arith.constant 64 : index
    %c0_37 = arith.constant 0 : index
    %86 = vector.load %arg9[%c64_36, %c0_37] : memref<192x128xbf16, #tpu.memory_space<vmem>>, vector<64x128xbf16>
    tpu.vector_store %arg9[%c64_36, %c0_37], %85 {strides = array<i32>} : memref<192x128xbf16, #tpu.memory_space<vmem>>, vector<64x128xbf16>,
    %c127_i32_38 = arith.constant 127 : i32
    %87 = tpu.dynamic_rotate %77 by %c127_i32_38 dim 1 : vector<64x128xf32>, i32 -> vector<64x128xf32>
    %88 = vector.broadcast %40 : vector<1x128xf32> to vector<64x128xf32>
    %89 = arith.mulf %87, %88 : vector<64x128xf32>
    %90 = arith.truncf %89 : vector<64x128xf32> to vector<64x128xbf16>
    %c128_39 = arith.constant 128 : index
    %c0_40 = arith.constant 0 : index
    %91 = vector.load %arg9[%c128_39, %c0_40] : memref<192x128xbf16, #tpu.memory_space<vmem>>, vector<64x128xbf16>
    tpu.vector_store %arg9[%c128_39, %c0_40], %90 {strides = array<i32>} : memref<192x128xbf16, #tpu.memory_space<vmem>>, vector<64x128xbf16>,
    %c0_41 = arith.constant 0 : index
    %c0_42 = arith.constant 0 : index
    %92 = vector.load %arg9[%c0_41, %c0_42] : memref<192x128xbf16, #tpu.memory_space<vmem>>, vector<192x128xbf16>
    %cst_43 = arith.constant dense<0.000000e+00> : vector<64x128xf32>
    %93 = tpu.matmul %79, %92, %cst_43 {dimension_numbers = #tpu.dot_dimension_numbers<[1], [0], [0], [1], [0, 0, 1, 1], [], []>} : vector<64x192xbf16>, vector<192x128xbf16>, vector<64x128xf32> -> vector<64x128xf32>
    %94 = vector.extract_strided_slice %41 {offsets = [0, 2], sizes = [64, 1], strides = [1, 1]} : vector<64x4xf32> to vector<64x1xf32>
    %95 = vector.extract_strided_slice %41 {offsets = [0, 3], sizes = [64, 1], strides = [1, 1]} : vector<64x4xf32> to vector<64x1xf32>
    %cst_44 = arith.constant dense<0.000000e+00> : vector<64xf32>
    %96 = vector.multi_reduction <add>, %93, %cst_44 [1] : vector<64x128xf32> to vector<64xf32>
    %97 = vector.shape_cast %96 : vector<64xf32> to vector<64x1xf32>
    %cst_45 = arith.constant 7.812500e-03 : f32
    %98 = vector.broadcast %cst_45 : f32 to vector<64x1xf32>
    %99 = arith.mulf %97, %98 : vector<64x1xf32>
    %100 = vector.broadcast %99 : vector<64x1xf32> to vector<64x128xf32>
    %101 = arith.subf %93, %100 : vector<64x128xf32>
    %102 = arith.mulf %101, %101 : vector<64x128xf32>
    %cst_46 = arith.constant dense<0.000000e+00> : vector<64xf32>
    %103 = vector.multi_reduction <add>, %102, %cst_46 [1] : vector<64x128xf32> to vector<64xf32>
    %104 = vector.shape_cast %103 : vector<64xf32> to vector<64x1xf32>
    %cst_47 = arith.constant 7.812500e-03 : f32
    %105 = vector.broadcast %cst_47 : f32 to vector<64x1xf32>
    %106 = arith.mulf %104, %105 : vector<64x1xf32>
    %cst_48 = arith.constant 9.99999974E-6 : f32
    %107 = vector.broadcast %cst_48 : f32 to vector<64x1xf32>
    %108 = arith.addf %106, %107 : vector<64x1xf32>
    %109 = math.rsqrt %108 : vector<64x1xf32>
    %110 = arith.mulf %94, %109 : vector<64x1xf32>
    %111 = vector.broadcast %110 : vector<64x1xf32> to vector<64x128xf32>
    %112 = arith.mulf %101, %111 : vector<64x128xf32>
    %113 = vector.broadcast %95 : vector<64x1xf32> to vector<64x128xf32>
    %114 = arith.addf %112, %113 : vector<64x128xf32>
    %cst_49 = arith.constant 0.000000e+00 : f32
    %115 = vector.broadcast %cst_49 : f32 to vector<64x128xf32>
    %116 = arith.maximumf %114, %115 : vector<64x128xf32>
    %c0_50 = arith.constant 0 : index
    %c0_51 = arith.constant 0 : index
    %117 = vector.load %arg4[%c0_50, %c0_51] : memref<32x192xbf16, #tpu.memory_space<vmem>>, vector<32x192xbf16>
    %c1_i32_52 = arith.constant 1 : i32
    %118 = tpu.dynamic_rotate %116 by %c1_i32_52 dim 1 : vector<64x128xf32>, i32 -> vector<64x128xf32>
    %119 = vector.broadcast %20 : vector<1x128xf32> to vector<64x128xf32>
    %120 = arith.mulf %118, %119 : vector<64x128xf32>
    %121 = arith.truncf %120 : vector<64x128xf32> to vector<64x128xbf16>
    %c0_53 = arith.constant 0 : index
    %c0_54 = arith.constant 0 : index
    %122 = vector.load %arg9[%c0_53, %c0_54] : memref<192x128xbf16, #tpu.memory_space<vmem>>, vector<64x128xbf16>
    tpu.vector_store %arg9[%c0_53, %c0_54], %121 {strides = array<i32>} : memref<192x128xbf16, #tpu.memory_space<vmem>>, vector<64x128xbf16>,
    %123 = arith.truncf %116 : vector<64x128xf32> to vector<64x128xbf16>
    %c64_55 = arith.constant 64 : index
    %c0_56 = arith.constant 0 : index
    %124 = vector.load %arg9[%c64_55, %c0_56] : memref<192x128xbf16, #tpu.memory_space<vmem>>, vector<64x128xbf16>
    tpu.vector_store %arg9[%c64_55, %c0_56], %123 {strides = array<i32>} : memref<192x128xbf16, #tpu.memory_space<vmem>>, vector<64x128xbf16>,
    %c127_i32_57 = arith.constant 127 : i32
    %125 = tpu.dynamic_rotate %116 by %c127_i32_57 dim 1 : vector<64x128xf32>, i32 -> vector<64x128xf32>
    %126 = vector.broadcast %40 : vector<1x128xf32> to vector<64x128xf32>
    %127 = arith.mulf %125, %126 : vector<64x128xf32>
    %128 = arith.truncf %127 : vector<64x128xf32> to vector<64x128xbf16>
    %c128_58 = arith.constant 128 : index
    %c0_59 = arith.constant 0 : index
    %129 = vector.load %arg9[%c128_58, %c0_59] : memref<192x128xbf16, #tpu.memory_space<vmem>>, vector<64x128xbf16>
    tpu.vector_store %arg9[%c128_58, %c0_59], %128 {strides = array<i32>} : memref<192x128xbf16, #tpu.memory_space<vmem>>, vector<64x128xbf16>,
    %c0_60 = arith.constant 0 : index
    %c0_61 = arith.constant 0 : index
    %130 = vector.load %arg9[%c0_60, %c0_61] : memref<192x128xbf16, #tpu.memory_space<vmem>>, vector<192x128xbf16>
    %cst_62 = arith.constant dense<0.000000e+00> : vector<32x128xf32>
    %131 = tpu.matmul %117, %130, %cst_62 {dimension_numbers = #tpu.dot_dimension_numbers<[1], [0], [0], [1], [0, 0, 1, 1], [], []>} : vector<32x192xbf16>, vector<192x128xbf16>, vector<32x128xf32> -> vector<32x128xf32>
    %132 = vector.extract_strided_slice %42 {offsets = [0, 0], sizes = [32, 1], strides = [1, 1]} : vector<32x4xf32> to vector<32x1xf32>
    %133 = vector.extract_strided_slice %42 {offsets = [0, 1], sizes = [32, 1], strides = [1, 1]} : vector<32x4xf32> to vector<32x1xf32>
    %cst_63 = arith.constant dense<0.000000e+00> : vector<32xf32>
    %134 = vector.multi_reduction <add>, %131, %cst_63 [1] : vector<32x128xf32> to vector<32xf32>
    %135 = vector.shape_cast %134 : vector<32xf32> to vector<32x1xf32>
    %cst_64 = arith.constant 7.812500e-03 : f32
    %136 = vector.broadcast %cst_64 : f32 to vector<32x1xf32>
    %137 = arith.mulf %135, %136 : vector<32x1xf32>
    %138 = vector.broadcast %137 : vector<32x1xf32> to vector<32x128xf32>
    %139 = arith.subf %131, %138 : vector<32x128xf32>
    %140 = arith.mulf %139, %139 : vector<32x128xf32>
    %cst_65 = arith.constant dense<0.000000e+00> : vector<32xf32>
    %141 = vector.multi_reduction <add>, %140, %cst_65 [1] : vector<32x128xf32> to vector<32xf32>
    %142 = vector.shape_cast %141 : vector<32xf32> to vector<32x1xf32>
    %cst_66 = arith.constant 7.812500e-03 : f32
    %143 = vector.broadcast %cst_66 : f32 to vector<32x1xf32>
    %144 = arith.mulf %142, %143 : vector<32x1xf32>
    %cst_67 = arith.constant 9.99999974E-6 : f32
    %145 = vector.broadcast %cst_67 : f32 to vector<32x1xf32>
    %146 = arith.addf %144, %145 : vector<32x1xf32>
    %147 = math.rsqrt %146 : vector<32x1xf32>
    %148 = arith.mulf %132, %147 : vector<32x1xf32>
    %149 = vector.broadcast %148 : vector<32x1xf32> to vector<32x128xf32>
    %150 = arith.mulf %139, %149 : vector<32x128xf32>
    %151 = vector.broadcast %133 : vector<32x1xf32> to vector<32x128xf32>
    %152 = arith.addf %150, %151 : vector<32x128xf32>
    %cst_68 = arith.constant 0.000000e+00 : f32
    %153 = vector.broadcast %cst_68 : f32 to vector<32x128xf32>
    %154 = arith.maximumf %152, %153 : vector<32x128xf32>
    %c0_69 = arith.constant 0 : index
    %c0_70 = arith.constant 0 : index
    %155 = vector.load %arg1[%c0_69, %c0_70] : memref<16x128xf32, #tpu.memory_space<vmem>>, vector<16x128xf32>
    %c0_71 = arith.constant 0 : index
    %c0_72 = arith.constant 0 : index
    %156 = vector.load %arg5[%c0_71, %c0_72] : memref<32x144xbf16, #tpu.memory_space<vmem>>, vector<32x144xbf16>
    %c1_i32_73 = arith.constant 1 : i32
    %157 = tpu.dynamic_rotate %154 by %c1_i32_73 dim 1 : vector<32x128xf32>, i32 -> vector<32x128xf32>
    %158 = vector.broadcast %20 : vector<1x128xf32> to vector<32x128xf32>
    %159 = arith.mulf %157, %158 : vector<32x128xf32>
    %160 = arith.truncf %159 : vector<32x128xf32> to vector<32x128xbf16>
    %c0_74 = arith.constant 0 : index
    %c0_75 = arith.constant 0 : index
    %161 = vector.load %arg9[%c0_74, %c0_75] : memref<192x128xbf16, #tpu.memory_space<vmem>>, vector<32x128xbf16>
    tpu.vector_store %arg9[%c0_74, %c0_75], %160 {strides = array<i32>} : memref<192x128xbf16, #tpu.memory_space<vmem>>, vector<32x128xbf16>,
    %162 = arith.truncf %154 : vector<32x128xf32> to vector<32x128xbf16>
    %c48 = arith.constant 48 : index
    %c0_76 = arith.constant 0 : index
    %163 = vector.load %arg9[%c48, %c0_76] : memref<192x128xbf16, #tpu.memory_space<vmem>>, vector<32x128xbf16>
    tpu.vector_store %arg9[%c48, %c0_76], %162 {strides = array<i32>} : memref<192x128xbf16, #tpu.memory_space<vmem>>, vector<32x128xbf16>,
    %c127_i32_77 = arith.constant 127 : i32
    %164 = tpu.dynamic_rotate %154 by %c127_i32_77 dim 1 : vector<32x128xf32>, i32 -> vector<32x128xf32>
    %165 = vector.broadcast %40 : vector<1x128xf32> to vector<32x128xf32>
    %166 = arith.mulf %164, %165 : vector<32x128xf32>
    %167 = arith.truncf %166 : vector<32x128xf32> to vector<32x128xbf16>
    %c96 = arith.constant 96 : index
    %c0_78 = arith.constant 0 : index
    %168 = vector.load %arg9[%c96, %c0_78] : memref<192x128xbf16, #tpu.memory_space<vmem>>, vector<32x128xbf16>
    tpu.vector_store %arg9[%c96, %c0_78], %167 {strides = array<i32>} : memref<192x128xbf16, #tpu.memory_space<vmem>>, vector<32x128xbf16>,
    %c1_i32_79 = arith.constant 1 : i32
    %169 = tpu.dynamic_rotate %155 by %c1_i32_79 dim 1 : vector<16x128xf32>, i32 -> vector<16x128xf32>
    %170 = vector.broadcast %20 : vector<1x128xf32> to vector<16x128xf32>
    %171 = arith.mulf %169, %170 : vector<16x128xf32>
    %172 = arith.truncf %171 : vector<16x128xf32> to vector<16x128xbf16>
    %c32 = arith.constant 32 : index
    %c0_80 = arith.constant 0 : index
    %173 = vector.load %arg9[%c32, %c0_80] : memref<192x128xbf16, #tpu.memory_space<vmem>>, vector<16x128xbf16>
    tpu.vector_store %arg9[%c32, %c0_80], %172 {strides = array<i32>} : memref<192x128xbf16, #tpu.memory_space<vmem>>, vector<16x128xbf16>,
    %174 = arith.truncf %155 : vector<16x128xf32> to vector<16x128xbf16>
    %c80 = arith.constant 80 : index
    %c0_81 = arith.constant 0 : index
    %175 = vector.load %arg9[%c80, %c0_81] : memref<192x128xbf16, #tpu.memory_space<vmem>>, vector<16x128xbf16>
    tpu.vector_store %arg9[%c80, %c0_81], %174 {strides = array<i32>} : memref<192x128xbf16, #tpu.memory_space<vmem>>, vector<16x128xbf16>,
    %c127_i32_82 = arith.constant 127 : i32
    %176 = tpu.dynamic_rotate %155 by %c127_i32_82 dim 1 : vector<16x128xf32>, i32 -> vector<16x128xf32>
    %177 = vector.broadcast %40 : vector<1x128xf32> to vector<16x128xf32>
    %178 = arith.mulf %176, %177 : vector<16x128xf32>
    %179 = arith.truncf %178 : vector<16x128xf32> to vector<16x128xbf16>
    %c128_83 = arith.constant 128 : index
    %c0_84 = arith.constant 0 : index
    %180 = vector.load %arg9[%c128_83, %c0_84] : memref<192x128xbf16, #tpu.memory_space<vmem>>, vector<16x128xbf16>
    tpu.vector_store %arg9[%c128_83, %c0_84], %179 {strides = array<i32>} : memref<192x128xbf16, #tpu.memory_space<vmem>>, vector<16x128xbf16>,
    %c0_85 = arith.constant 0 : index
    %c0_86 = arith.constant 0 : index
    %181 = vector.load %arg9[%c0_85, %c0_86] : memref<192x128xbf16, #tpu.memory_space<vmem>>, vector<144x128xbf16>
    %cst_87 = arith.constant dense<0.000000e+00> : vector<32x128xf32>
    %182 = tpu.matmul %156, %181, %cst_87 {dimension_numbers = #tpu.dot_dimension_numbers<[1], [0], [0], [1], [0, 0, 1, 1], [], []>} : vector<32x144xbf16>, vector<144x128xbf16>, vector<32x128xf32> -> vector<32x128xf32>
    %183 = vector.extract_strided_slice %42 {offsets = [0, 2], sizes = [32, 1], strides = [1, 1]} : vector<32x4xf32> to vector<32x1xf32>
    %184 = vector.extract_strided_slice %42 {offsets = [0, 3], sizes = [32, 1], strides = [1, 1]} : vector<32x4xf32> to vector<32x1xf32>
    %cst_88 = arith.constant dense<0.000000e+00> : vector<32xf32>
    %185 = vector.multi_reduction <add>, %182, %cst_88 [1] : vector<32x128xf32> to vector<32xf32>
    %186 = vector.shape_cast %185 : vector<32xf32> to vector<32x1xf32>
    %cst_89 = arith.constant 7.812500e-03 : f32
    %187 = vector.broadcast %cst_89 : f32 to vector<32x1xf32>
    %188 = arith.mulf %186, %187 : vector<32x1xf32>
    %189 = vector.broadcast %188 : vector<32x1xf32> to vector<32x128xf32>
    %190 = arith.subf %182, %189 : vector<32x128xf32>
    %191 = arith.mulf %190, %190 : vector<32x128xf32>
    %cst_90 = arith.constant dense<0.000000e+00> : vector<32xf32>
    %192 = vector.multi_reduction <add>, %191, %cst_90 [1] : vector<32x128xf32> to vector<32xf32>
    %193 = vector.shape_cast %192 : vector<32xf32> to vector<32x1xf32>
    %cst_91 = arith.constant 7.812500e-03 : f32
    %194 = vector.broadcast %cst_91 : f32 to vector<32x1xf32>
    %195 = arith.mulf %193, %194 : vector<32x1xf32>
    %cst_92 = arith.constant 9.99999974E-6 : f32
    %196 = vector.broadcast %cst_92 : f32 to vector<32x1xf32>
    %197 = arith.addf %195, %196 : vector<32x1xf32>
    %198 = math.rsqrt %197 : vector<32x1xf32>
    %199 = arith.mulf %183, %198 : vector<32x1xf32>
    %200 = vector.broadcast %199 : vector<32x1xf32> to vector<32x128xf32>
    %201 = arith.mulf %190, %200 : vector<32x128xf32>
    %202 = vector.broadcast %184 : vector<32x1xf32> to vector<32x128xf32>
    %203 = arith.addf %201, %202 : vector<32x128xf32>
    %cst_93 = arith.constant 0.000000e+00 : f32
    %204 = vector.broadcast %cst_93 : f32 to vector<32x128xf32>
    %205 = arith.maximumf %203, %204 : vector<32x128xf32>
    %c0_94 = arith.constant 0 : index
    %c0_95 = arith.constant 0 : index
    %206 = vector.load %arg8[%c0_94, %c0_95] : memref<32x128xf32, #tpu.memory_space<vmem>>, vector<32x128xf32>
    tpu.vector_store %arg8[%c0_94, %c0_95], %205 {strides = array<i32>} : memref<32x128xf32, #tpu.memory_space<vmem>>, vector<32x128xf32>,
    return
  }
}

</mosaic_0001>

<bundles_post_ra>
// kernel: tpu_custom_call.1
= control target key start
LH: loop header
LB: loop body
LE: loop exit
PB: predicated region body
PF: predicated region fallthrough
CT: control target
= control target key end

     0   :  { %13 = vsyncpa [#allocation4], 0  ;;  %s2678_s0 = inlined_call_operand.hbm [shape: bf16[128,128], index: 0, kind: input, shape index: {}]   ;;  %s2679_s1 = inlined_call_operand.hbm [shape: f32[16,128], index: 1, kind: input, shape index: {}]   ;;  %s2680_s2 = inlined_call_operand.hbm [shape: bf16[64,128], index: 2, kind: input, shape index: {}]   ;;  %s2681_s3 = inlined_call_operand.hbm [shape: bf16[2,64,192], index: 3, kind: input, shape index: {}]   ;;  %s2682_s4 = inlined_call_operand.hbm [shape: bf16[32,192], index: 4, kind: input, shape index: {}]   ;;  %s2683_s5 = inlined_call_operand.hbm [shape: bf16[32,144], index: 5, kind: input, shape index: {}]   ;;  %s2684_s6 = inlined_call_operand.hbm [shape: f32[64,4], index: 6, kind: input, shape index: {}]   ;;  %s2685_s7 = inlined_call_operand.hbm [shape: f32[32,4], index: 7, kind: input, shape index: {}]   ;;  %s2686_s8 = inlined_call_operand.hbm [shape: f32[32,128], index: 8, kind: output, shape index: {}]  }
   0x1   :  { %14 = vsyncpa [#allocation7], 0 }
   0x2   :  { %15 = vsyncpa [#allocation10], 0 }
   0x3   :  { %16 = vsyncpa [#allocation13], 0 }
   0x4   :  { %17 = vsyncpa [#allocation16], 0 }
   0x5   :  { %18 = vsyncpa [#allocation5], 0  ;;  %s2051_s27 = smov [#allocation6]   ;;  %s1841_s9 = scalar_lea.hbm %s2679_s1, 256 }
   0x6   :  { %s36_s28 = sshll.u32 %s2051_s27, 4  ;;  %p1842_p0 = scmp.ne.s32.totalorder %s2679_s1, %s1841_s9  ;;  %s37_s28 = int_to_ptr.vmem [resolvable:$true] %s36_s28 }
   0x7   :  { %p1845_p1 = scmp.lt.u32.totalorder %s1841_s9, %s2679_s1 }
   0x9   :  { %p1847_p2 = pnand %p1845_p1, %p1842_p0 }
   0xb   :  { %1850 = shalt.err (!%p1847_p2)
}
   0xc   :  { %s1851_s14 = scalar_lea.vmem %s37_s28, 256  ;;  %p1856_p4 = scmp.lt.s32.totalorder %s37_s28, %s37_s28 }
   0xd   :  { %p1852_p3 = scmp.ne.s32.totalorder %s37_s28, %s1851_s14  ;;  %p1857_p5 = scmp.lt.s32.totalorder %s1851_s14, %s1851_s14 }
   0xf   :  { %p1858_p6 = por %p1857_p5, %p1856_p4 }
  0x11   :  { %p1859_p7 = pnand %p1858_p6, %p1852_p3 }
  0x13   :  { %1862 = shalt.err (!%p1859_p7)
}
  0x14   :  { %s2052_s15 = smov 128   ;;  %s2053_s16 = smov 8  }
  0x15   :  { %42 = dma.hbm_to_vmem [thread:$0]  %s2679_s1, 256, %s37_s28, [#allocation7], %s2052_s15, %s2052_s15, %s2053_s16  }
  0x16   :  { %s2054_s19 = smov [#allocation9]   ;;  %s2055_s21 = smov [#allocation12]  }
  0x17   :  { %s60_s20 = sshll.u32 %s2054_s19, 4  ;;  %s84_s22 = sshll.u32 %s2055_s21, 4  ;;  %s61_s20 = int_to_ptr.vmem [resolvable:$true] %s60_s20  ;;  %s85_s22 = int_to_ptr.vmem [resolvable:$true] %s84_s22 }
  0x18   :  { %s1863_s25 = scalar_lea.hbm %s2681_s3, 2048 }
  0x19   :  { %p1864_p8 = scmp.ne.s32.totalorder %s2681_s3, %s1863_s25  ;;  %p1867_p9 = scmp.lt.u32.totalorder %s1863_s25, %s2681_s3 }
  0x1b   :  { %p1869_p10 = pnand %p1867_p9, %p1864_p8 }
  0x1d   :  { %1872 = shalt.err (!%p1869_p10)
}
  0x1e   :  { %s1873_s1 = scalar_lea.vmem %s61_s20, 2048  ;;  %p1878_p12 = scmp.lt.s32.totalorder %s61_s20, %s61_s20 }
  0x1f   :  { %p1874_p11 = scmp.ne.s32.totalorder %s61_s20, %s1873_s1  ;;  %p1879_p13 = scmp.lt.s32.totalorder %s1873_s1, %s1873_s1 }
  0x21   :  { %p1880_p0 = por %p1879_p13, %p1878_p12 }
  0x23   :  { %p1881_p1 = pnand %p1880_p0, %p1874_p11 }
  0x25   :  { %1884 = shalt.err (!%p1881_p1)
}
  0x26   :  { %66 = dma.hbm_to_vmem [thread:$0]  %s2681_s3, 2048, %s61_s20, [#allocation10], %s2052_s15, %s2052_s15, %s2053_s16  }
  0x27   :  { %s1885_s12 = scalar_lea.hbm %s2683_s5, 512 }
  0x28   :  { %p1886_p2 = scmp.ne.s32.totalorder %s2683_s5, %s1885_s12  ;;  %p1889_p3 = scmp.lt.u32.totalorder %s1885_s12, %s2683_s5 }
  0x2a   :  { %p1891_p4 = pnand %p1889_p3, %p1886_p2 }
  0x2c   :  { %1894 = shalt.err (!%p1891_p4)
}
  0x2d   :  { %s1895_s19 = scalar_lea.vmem %s85_s22, 512  ;;  %p1900_p6 = scmp.lt.s32.totalorder %s85_s22, %s85_s22 }
  0x2e   :  { %p1896_p5 = scmp.ne.s32.totalorder %s85_s22, %s1895_s19  ;;  %p1901_p7 = scmp.lt.s32.totalorder %s1895_s19, %s1895_s19 }
  0x30   :  { %p1902_p8 = por %p1901_p7, %p1900_p6 }
  0x32   :  { %p1903_p9 = pnand %p1902_p8, %p1896_p5 }
  0x34   :  { %1906 = shalt.err (!%p1903_p9)
}
  0x35   :  { %90 = dma.hbm_to_vmem [thread:$0]  %s2683_s5, 512, %s85_s22, [#allocation13], %s2052_s15, %s2052_s15, %s2053_s16  }
  0x36   :  { %s2056_s21 = smov [#allocation3]   ;;  %s1907_s26 = scalar_lea.hbm %s2678_s0, 1024 }
  0x37   :  { %s24_s23 = sshll.u32 %s2056_s21, 4  ;;  %p1908_p10 = scmp.ne.s32.totalorder %s2678_s0, %s1907_s26  ;;  %s25_s23 = int_to_ptr.vmem [resolvable:$true] %s24_s23 }
  0x38   :  { %p1911_p11 = scmp.lt.u32.totalorder %s1907_s26, %s2678_s0 }
  0x3a   :  { %p1913_p12 = pnand %p1911_p11, %p1908_p10 }
  0x3c   :  { %1916 = shalt.err (!%p1913_p12)
}
  0x3d   :  { %s1917_s28 = scalar_lea.vmem %s25_s23, 1024  ;;  %p1922_p0 = scmp.lt.s32.totalorder %s25_s23, %s25_s23 }
  0x3e   :  { %p1918_p13 = scmp.ne.s32.totalorder %s25_s23, %s1917_s28  ;;  %p1923_p1 = scmp.lt.s32.totalorder %s1917_s28, %s1917_s28 }
  0x40   :  { %p1924_p2 = por %p1923_p1, %p1922_p0 }
  0x42   :  { %p1925_p3 = pnand %p1924_p2, %p1918_p13 }
  0x44   :  { %1928 = shalt.err (!%p1925_p3)
}
  0x45   :  { %s2057_s5 = smov 64   ;;  %s2058_s22 = smov 4  }
  0x46   :  { %30 = dma.hbm_to_vmem [thread:$0]  %s2678_s0, 1024, %s25_s23, [#allocation4], %s2057_s5, %s2057_s5, %s2058_s22  }
  0x47   :  { %s2059_s11 = smov [#allocation8]   ;;  %s2060_s13 = smov [#allocation11]  }
  0x48   :  { %s48_s12 = sshll.u32 %s2059_s11, 4  ;;  %s72_s14 = sshll.u32 %s2060_s13, 4  ;;  %s49_s12 = int_to_ptr.vmem [resolvable:$true] %s48_s12  ;;  %s2173_s14 = int_to_ptr.vmem [resolvable:$true] %s72_s14 }
  0x49   :  { %s1929_s19 = scalar_lea.hbm %s2680_s2, 512 }
  0x4a   :  { %p1930_p4 = scmp.ne.s32.totalorder %s2680_s2, %s1929_s19  ;;  %p1933_p5 = scmp.lt.u32.totalorder %s1929_s19, %s2680_s2 }
  0x4c   :  { %p1935_p6 = pnand %p1933_p5, %p1930_p4 }
  0x4e   :  { %1938 = shalt.err (!%p1935_p6)
}
  0x4f   :  { %s1939_s0 = scalar_lea.vmem %s49_s12, 512  ;;  %p1944_p8 = scmp.lt.s32.totalorder %s49_s12, %s49_s12 }
  0x50   :  { %p1940_p7 = scmp.ne.s32.totalorder %s49_s12, %s1939_s0  ;;  %p1945_p9 = scmp.lt.s32.totalorder %s1939_s0, %s1939_s0 }
  0x52   :  { %p1946_p10 = por %p1945_p9, %p1944_p8 }
  0x54   :  { %p1947_p11 = pnand %p1946_p10, %p1940_p7 }
  0x56   :  { %1950 = shalt.err (!%p1947_p11)
}
  0x57   :  { %54 = dma.hbm_to_vmem [thread:$0]  %s2680_s2, 512, %s49_s12, [#allocation7], %s2057_s5, %s2057_s5, %s2058_s22  }
  0x58   :  { %s1951_s29 = scalar_lea.hbm %s2682_s4, 512 }
  0x59   :  { %p1952_p12 = scmp.ne.s32.totalorder %s2682_s4, %s1951_s29  ;;  %p1955_p13 = scmp.lt.u32.totalorder %s1951_s29, %s2682_s4 }
  0x5b   :  { %p1957_p0 = pnand %p1955_p13, %p1952_p12 }
  0x5d   :  { %1960 = shalt.err (!%p1957_p0)
}
  0x5e   :  { %s1961_s10 = scalar_lea.vmem %s2173_s14, 512  ;;  %p1966_p2 = scmp.lt.s32.totalorder %s2173_s14, %s2173_s14 }
  0x5f   :  { %p1962_p1 = scmp.ne.s32.totalorder %s2173_s14, %s1961_s10  ;;  %p1967_p3 = scmp.lt.s32.totalorder %s1961_s10, %s1961_s10 }
  0x61   :  { %p1968_p4 = por %p1967_p3, %p1966_p2 }
  0x63   :  { %p1969_p5 = pnand %p1968_p4, %p1962_p1 }
  0x65   :  { %1972 = shalt.err (!%p1969_p5)
}
  0x66   :  { %78 = dma.hbm_to_vmem [thread:$0]  %s2682_s4, 512, %s2173_s14, [#allocation10], %s2052_s15, %s2052_s15, %s2053_s16  }
  0x67   :  { %s2061_s22 = smov [#allocation14]   ;;  %s2062_s12 = smov [#allocation15]  }
  0x68   :  { %s96_s11 = sshll.u32 %s2061_s22, 4  ;;  %s108_s13 = sshll.u32 %s2062_s12, 4  ;;  %s97_s11 = int_to_ptr.vmem [resolvable:$true] %s96_s11  ;;  %s2207_s13 = int_to_ptr.vmem [resolvable:$true] %s108_s13 }
  0x69   :  { %s1973_s19 = scalar_lea.hbm %s2684_s6, 1024 }
  0x6a   :  { %p1974_p6 = scmp.ne.s32.totalorder %s2684_s6, %s1973_s19  ;;  %p1977_p7 = scmp.lt.u32.totalorder %s1973_s19, %s2684_s6 }
  0x6c   :  { %p1979_p8 = pnand %p1977_p7, %p1974_p6 }
  0x6e   :  { %1982 = shalt.err (!%p1979_p8)
}
  0x6f   :  { %s1983_s4 = scalar_lea.vmem %s97_s11, 1024  ;;  %p1988_p10 = scmp.lt.s32.totalorder %s97_s11, %s97_s11 }
  0x70   :  { %p1984_p9 = scmp.ne.s32.totalorder %s97_s11, %s1983_s4  ;;  %p1989_p11 = scmp.lt.s32.totalorder %s1983_s4, %s1983_s4 }
  0x72   :  { %p1990_p12 = por %p1989_p11, %p1988_p10 }
  0x74   :  { %p1991_p13 = pnand %p1990_p12, %p1984_p9 }
  0x76   :  { %1994 = shalt.err (!%p1991_p13)
}
  0x77   :  { %102 = dma.hbm_to_vmem [thread:$0]  %s2684_s6, 1024, %s97_s11, [#allocation13], %s2052_s15, %s2052_s15, %s2053_s16  }
  0x78   :  { %s1995_s26 = scalar_lea.hbm %s2685_s7, 512 }
  0x79   :  { %p1996_p0 = scmp.ne.s32.totalorder %s2685_s7, %s1995_s26  ;;  %p1999_p1 = scmp.lt.u32.totalorder %s1995_s26, %s2685_s7 }
  0x7b   :  { %p2001_p2 = pnand %p1999_p1, %p1996_p0 }
  0x7d   :  { %2004 = shalt.err (!%p2001_p2)
}
  0x7e   :  { %s2005_s28 = scalar_lea.vmem %s2207_s13, 512  ;;  %p2010_p4 = scmp.lt.s32.totalorder %s2207_s13, %s2207_s13 }
  0x7f   :  { %p2006_p3 = scmp.ne.s32.totalorder %s2207_s13, %s2005_s28  ;;  %p2011_p5 = scmp.lt.s32.totalorder %s2005_s28, %s2005_s28 }
  0x81   :  { %p2012_p6 = por %p2011_p5, %p2010_p4 }
  0x83   :  { %p2013_p7 = pnand %p2012_p6, %p2006_p3 }
  0x85   :  { %2016 = shalt.err (!%p2013_p7)
}
  0x86   :  { %114 = dma.hbm_to_vmem [thread:$0]  %s2685_s7, 512, %s2207_s13, [#allocation16], %s2052_s15, %s2052_s15, %s2053_s16  }
  0x87   :  { %2039 = dma.done.wait [#allocation4], 1024  }
  0x88   :  { %2040 = vsyncadd [#allocation4], 4294966272 }
  0x89   :  { %2041 = dma.done.wait [#allocation7], 768  }
  0x8a   :  { %2042 = vsyncadd [#allocation7], 4294966528 }
  0x8b   :  { %2043 = dma.done.wait [#allocation10], 2560  }
  0x8c   :  { %2044 = vsyncadd [#allocation10], 4294964736 }
  0x8d   :  { %2045 = dma.done.wait [#allocation13], 1536  }
  0x8e   :  { %2046 = vsyncadd [#allocation13], 4294965760 }
  0x8f   :  { %2047 = dma.done.wait [#allocation16], 512  }
  0x90   :  { %2048 = vsyncadd [#allocation16], 4294966784  ;;  %v2063_v0 = vmov 0   ;;  %v1725_v1 = vld [vmem:[#allocation3] sm:$0xff]   ;;  %v1726_v2 = vld [vmem:[#allocation3 + $0x8] sm:$0xff]   ;;  %s2064_s7 = smov 1   ;;  %v140_v55 = vlaneseq }
  0x91   :  { %1704 = vset.pattern.permute.xlu0 %v2063_v0  ;;  %1705 = vset.pattern.permute.xlu1 %v2063_v0  ;;  %v1727_v3 = vld [vmem:[#allocation3 + $0x10] sm:$0xff]   ;;  %v1728_v4 = vld [vmem:[#allocation3 + $0x18] sm:$0xff]   ;;  %v1729_v6 = vld [vmem:[#allocation3 + $0x20] sm:$0xff]   ;;  %s2065_s10 = smov 127   ;;  %vm541_vm0 = vcmask 523264   ;;  %v2066_v54 = vmov 1  }
  0x92   :  { %554 = vmatprep.subr.bf16.mxu1 %v2063_v0  ;;  %1660 = vmatprep.subr.bf16.mxu0 %v1725_v1  ;;  %v1733_v5 = vld [vmem:[#allocation8] sm:$0xff]   ;;  %v2249_v8 = vld [vmem:[#allocation14 + $0x10] sm:$0xff]  ;;  %v1730_v9 = vld [vmem:[#allocation3 + $0x28] sm:$0xff]   ;;  %v141_v56 = vand.u32 127, %v140_v55  ;;  %v2067_v58 = vmov 0.0   ;;  %vm1417_vm3 = vcmask 130048  }
  0x93   :  { %1661 = vmatpush3.bf16.msra.mxu0 %v1725_v1  ;;  %1676 = vmatprep.mubr.bf16.mxu0 %v1733_v5  ;;  %v2247_v7 = vld [vmem:[#allocation14] sm:$0xff]  ;;  %v2253_v10 = vld [vmem:[#allocation14 + $0x8] sm:$0xff]  ;;  %v2255_v11 = vld [vmem:[#allocation14 + $0x18] sm:$0xff]  ;;  %s2070_s2 = smov [#allocation17]  }
  0x94   :  { %1662 = vmatprep.subr.bf16.mxu0 %v1726_v2  ;;  %198 = vperm.xlu0 %1704, %v2247_v7   ;;  %v2257_v12 = vld [vmem:[#allocation14 + $0x20] sm:$0xff]  ;;  %v2259_v13 = vld [vmem:[#allocation14 + $0x28] sm:$0xff]  ;;  %v2263_v15 = vld [vmem:[#allocation14 + $0x30] sm:$0xff]  ;;  %v146_v57 = vand.u32 63, %v141_v56  ;;  %s1574_s5 = sshll.u32 %s2070_s2, 4  ;;  %s1575_s5 = int_to_ptr.vmem [resolvable:$true] %s1574_s5 }
  0x95   :  { %208 = vperm.xlu1 %1705, %v2249_v8   ;;  %v1731_v14 = vld [vmem:[#allocation3 + $0x30] sm:$0xff]   ;;  %v2267_v16 = vld [vmem:[#allocation14 + $0x38] sm:$0xff]  ;;  %v1732_v17 = vld [vmem:[#allocation3 + $0x38] sm:$0xff]   ;;  %s2017_s22 = scalar_lea.vmem %s1575_s5, 512  ;;  %p2022_p9 = scmp.lt.s32.totalorder %s1575_s5, %s1575_s5 }
  0x96   :  { %v1734_v18 = vld [vmem:[#allocation8 + $0x8] sm:$0xff]   ;;  %v1735_v19 = vld [vmem:[#allocation8 + $0x10] sm:$0xff]   ;;  %v1736_v20 = vld [vmem:[#allocation8 + $0x18] sm:$0xff]   ;;  %vm154_vm1 = vcmp.ne.s32.totalorder %v146_v57, 0  ;;  %vm157_vm2 = vcmp.ne.s32.totalorder %v146_v57, 63  ;;  %p2018_p8 = scmp.ne.s32.totalorder %s1575_s5, %s2017_s22  ;;  %p2023_p10 = scmp.lt.s32.totalorder %s2017_s22, %s2017_s22 }
  0x97   :  { %1663 = vmatpush3.bf16.msra.mxu0 %v1726_v2  ;;  %v1739_v53 = vld [vmem:[#allocation9 + $0x4] ss:$8 sps:$4 sm:$0xff]   ;;  %v2331_v59 = vsel %vm154_vm1, 1.0, %v2067_v58 }
  0x98   :  { %1664 = vmatprep.subr.bf16.mxu0 %v1727_v3  ;;  %203 = vperm.xlu0 %1704, %v2253_v10   ;;  %p2024_p11 = por %p2023_p10, %p2022_p9 }
  0x99   :  { %213 = vperm.xlu1 %1705, %v2255_v11   ;;  %1612 = vmatprep.mubr.msk.bf16.mxu1 %vm541_vm0, %v1739_v53 }
  0x9a   :  { %p2025_p12 = pnand %p2024_p11, %p2018_p8 }
  0x9b   :  { %1665 = vmatpush3.bf16.msra.mxu0 %v1727_v3 }
  0x9c   :  { %1666 = vmatprep.subr.bf16.mxu0 %v1728_v4  ;;  %218 = vperm.xlu0 %1704, %v2257_v12  }
  0x9d   :  { %223 = vperm.xlu1 %1705, %v2259_v13  }
  0x9f   :  { %1667 = vmatpush3.bf16.msra.mxu0 %v1728_v4 }
  0xa0   :  { %1668 = vmatprep.subr.bf16.mxu0 %v1729_v6  ;;  %228 = vperm.xlu0 %1704, %v2263_v15  }
  0xa1   :  { %233 = vperm.xlu1 %1705, %v2267_v16  }
  0xa3   :  { %1669 = vmatpush3.bf16.msra.mxu0 %v1729_v6 }
  0xa4   :  { %1670 = vmatprep.subr.bf16.mxu0 %v1730_v9  ;;  %1706 = vset.pattern.permute.xlu0 %v2066_v54 }
  0xa5   :  { %1707 = vset.pattern.permute.xlu1 %v2066_v54 }
  0xa7   :  { %1671 = vmatpush3.bf16.msra.mxu0 %v1730_v9 }
  0xa8   :  { %1672 = vmatprep.subr.bf16.mxu0 %v1731_v14 }
  0xab   :  { %1673 = vmatpush3.bf16.msra.mxu0 %v1731_v14 }
  0xac   :  { %1674 = vmatprep.subr.bf16.mxu0 %v1732_v17 }
  0xaf   :  { %1675 = vmatpush3.bf16.msra.mxu0 %v1732_v17 }
  0xb0   :  { %824 = vmatprep.subr.bf16.mxu0 %v2063_v0 }
  0xb2   :  { %1677 = vmatmul.mubr.bf16.vlgmr.msra.gmra.mrb[0].mxu0 %v1734_v18 }
  0xb3   :  { %1680 = vmatprep.mubr.bf16.mxu0 %v1735_v19 }
  0xba   :  { %1681 = vmatmul.mubr.bf16.gmra.mrb[4].mxu0 %v1736_v20 }
 0x113   :  { %v199_v21 = vpop.permute.xlu0 %198 }
 0x114   :  { %v209_v22 = vpop.permute.xlu1 %208 }
 0x117   :  { %v204_v23 = vpop.permute.xlu0 %203 }
 0x118   :  { %v214_v25 = vpop.permute.xlu1 %213 }
 0x11b   :  { %v219_v33 = vpop.permute.xlu0 %218 }
 0x11c   :  { %v224_v36 = vpop.permute.xlu1 %223 }
 0x11f   :  { %v229_v43 = vpop.permute.xlu0 %228 }
 0x120   :  { %v234_v48 = vpop.permute.xlu1 %233 }
 0x185   :  { %v1678_v24 = vpop.f32.mrb[0].mxu0 }
 0x186   :  { %v342_v26 = vpop.f32.mrb[1].mxu0  ;;  %v351_v30 = vadd.f32 %v1678_v24, %v209_v22 }
 0x187   :  { %v343_v27 = vadd.f32 %v342_v26, %v199_v21  ;;  %v1679_v28 = vpop.f32.mrb[2].mxu0 }
 0x188   :  { %v345_v29 = vpop.f32.mrb[3].mxu0  ;;  %v354_v34 = vadd.f32 %v1679_v28, %v214_v25  ;;  %v2278_v37 = vmax.f32 %v351_v30, 0.0 }
 0x189   :  { %v2272_v31 = vmax.f32 %v343_v27, 0.0  ;;  %v346_v32 = vadd.f32 %v345_v29, %v204_v23 }
 0x18a   :  { %v2282_v40 = vmax.f32 %v354_v34, 0.0 }
 0x18b   :  { %v2274_v35 = vmax.f32 %v346_v32, 0.0  ;;  %389 = vrot.lane.b32.xlu0 %v2272_v31, %s2064_s7  ;;  %v2353_v32 = vsel %vm157_vm2, 1.0, %v2067_v58 }
 0x18c   :  { %v422_v27 = vpack.c.bf16 %v2282_v40, %v2278_v37 }
 0x18d   :  { %v1682_v38 = vpop.f32.mrb[4].mxu0  ;;  %391 = vrot.lane.b32.xlu1 %v2274_v35, %s2064_s7  ;;  %v421_v25 = vpack.c.bf16 %v2274_v35, %v2272_v31 }
 0x18e   :  { %v358_v39 = vpop.f32.mrb[5].mxu0  ;;  %v367_v45 = vadd.f32 %v1682_v38, %v229_v43 }
 0x18f   :  { %v359_v41 = vadd.f32 %v358_v39, %v219_v33  ;;  %v1683_v42 = vpop.f32.mrb[6].mxu0  ;;  %393 = vrot.lane.b32.xlu0 %v2278_v37, %s2064_s7 }
 0x190   :  { %v361_v44 = vpop.f32.mrb[7].mxu0  ;;  %v370_v49 = vadd.f32 %v1683_v42, %v234_v48  ;;  %v2294_v51 = vmax.f32 %v367_v45, 0.0 }
 0x191   :  { %v2286_v46 = vmax.f32 %v359_v41, 0.0  ;;  %v362_v47 = vadd.f32 %v361_v44, %v224_v36  ;;  %395 = vrot.lane.b32.xlu1 %v2282_v40, %s2064_s7 }
 0x192   :  { %v2298_v52 = vmax.f32 %v370_v49, 0.0 }
 0x193   :  { %v2290_v50 = vmax.f32 %v362_v47, 0.0  ;;  %397 = vrot.lane.b32.xlu0 %v2286_v46, %s2064_s7 }
 0x194   :  { %v424_v36 = vpack.c.bf16 %v2298_v52, %v2294_v51 }
 0x195   :  { %399 = vrot.lane.b32.xlu1 %v2290_v50, %s2064_s7  ;;  %v423_v29 = vpack.c.bf16 %v2290_v50, %v2286_v46 }
 0x197   :  { %401 = vrot.lane.b32.xlu0 %v2294_v51, %s2064_s7 }
 0x199   :  { %403 = vrot.lane.b32.xlu1 %v2298_v52, %s2064_s7 }
 0x19b   :  { %429 = vrot.lane.b32.xlu0 %v2272_v31, %s2065_s10 }
 0x19d   :  { %431 = vrot.lane.b32.xlu1 %v2274_v35, %s2065_s10 }
 0x19f   :  { %433 = vrot.lane.b32.xlu0 %v2278_v37, %s2065_s10 }
 0x1a1   :  { %435 = vrot.lane.b32.xlu1 %v2282_v40, %s2065_s10 }
 0x1a3   :  { %437 = vrot.lane.b32.xlu0 %v2286_v46, %s2065_s10 }
 0x1a5   :  { %439 = vrot.lane.b32.xlu1 %v2290_v50, %s2065_s10 }
 0x1a7   :  { %441 = vrot.lane.b32.xlu0 %v2294_v51, %s2065_s10 }
 0x1a9   :  { %443 = vrot.lane.b32.xlu1 %v2298_v52, %s2065_s10 }
 0x1ab   :  { %474 = vperm.xlu0 %1706, %v2247_v7  }
 0x1ad   :  { %478 = vperm.xlu1 %1707, %v2253_v10  }
 0x1af   :  { %486 = vperm.xlu0 %1706, %v2255_v11  }
 0x1b1   :  { %482 = vperm.xlu1 %1707, %v2249_v8  }
 0x1b3   :  { %494 = vperm.xlu0 %1706, %v2259_v13  }
 0x1b5   :  { %490 = vperm.xlu1 %1707, %v2257_v12  }
 0x1b7   :  { %502 = vperm.xlu0 %1706, %v2267_v16  }
 0x1b9   :  { %498 = vperm.xlu1 %1707, %v2263_v15  }
 0x1fd   :  { %v390_v60 = vpop.permute.xlu0 %389 }
 0x1fe   :  { %v405_v62 = vmul.f32 %v2331_v59, %v390_v60  ;;  %v1737_v60 = vld [vmem:[#allocation9] ss:$8 sps:$4 sm:$0xff]  }
 0x1ff   :  { %v392_v61 = vpop.permute.xlu1 %391 }
 0x200   :  { %v406_v63 = vmul.f32 %v2331_v59, %v392_v61  ;;  %v1740_v61 = vld [vmem:[#allocation9 + $0x14] ss:$8 sps:$4 sm:$0xff]  }
 0x201   :  { %v394_v1 = vpop.permute.xlu0 %393 }
 0x202   :  { %v413_v2 = vpack.c.bf16 %v406_v63, %v405_v62  ;;  %v407_v4 = vmul.f32 %v2331_v59, %v394_v1  ;;  %v1742_v62 = vld [vmem:[#allocation9 + $0x10] ss:$8 sps:$4 sm:$0xff]   ;;  %v1743_v63 = vld [vmem:[#allocation9 + $0x24] ss:$8 sps:$4 sm:$0xff]   ;;  %v1745_v1 = vld [vmem:[#allocation9 + $0x20] ss:$8 sps:$4 sm:$0xff]  }
 0x203   :  { %v396_v3 = vpop.permute.xlu1 %395 }
 0x204   :  { %v408_v5 = vmul.f32 %v2331_v59, %v396_v3  ;;  %555 = vmatpush1.bf16.msra.mxu1 %v413_v2  ;;  %v1746_v2 = vld [vmem:[#allocation9 + $0x34] ss:$8 sps:$4 sm:$0xff]   ;;  %v1748_v3 = vld [vmem:[#allocation9 + $0x30] ss:$8 sps:$4 sm:$0xff]  }
 0x205   :  { %v398_v6 = vpop.permute.xlu0 %397  ;;  %556 = vmatprep.subr.bf16.mxu1 %v2063_v0 }
 0x206   :  { %v414_v9 = vpack.c.bf16 %v408_v5, %v407_v4  ;;  %v409_v17 = vmul.f32 %v2331_v59, %v398_v6 }
 0x207   :  { %v400_v14 = vpop.permute.xlu1 %399 }
 0x208   :  { %v410_v18 = vmul.f32 %v2331_v59, %v400_v14  ;;  %557 = vmatpush1.bf16.msra.mxu1 %v414_v9 }
 0x209   :  { %v402_v19 = vpop.permute.xlu0 %401  ;;  %558 = vmatprep.subr.bf16.mxu1 %v2063_v0 }
 0x20a   :  { %v415_v20 = vpack.c.bf16 %v410_v18, %v409_v17  ;;  %v411_v22 = vmul.f32 %v2331_v59, %v402_v19 }
 0x20b   :  { %v404_v21 = vpop.permute.xlu1 %403 }
 0x20c   :  { %v412_v23 = vmul.f32 %v2331_v59, %v404_v21  ;;  %559 = vmatpush1.bf16.msra.mxu1 %v415_v20 }
 0x20d   :  { %560 = vmatprep.subr.bf16.mxu1 %v2063_v0  ;;  %v430_v28 = vpop.permute.xlu0 %429 }
 0x20e   :  { %v416_v24 = vpack.c.bf16 %v412_v23, %v411_v22  ;;  %v445_v38 = vmul.f32 %v2353_v32, %v430_v28 }
 0x20f   :  { %v432_v26 = vpop.permute.xlu1 %431 }
 0x210   :  { %561 = vmatpush1.bf16.msra.mxu1 %v416_v24  ;;  %v446_v34 = vmul.f32 %v2353_v32, %v432_v26 }
 0x211   :  { %562 = vmatprep.subr.bf16.mxu1 %v2063_v0  ;;  %v434_v33 = vpop.permute.xlu0 %433 }
 0x212   :  { %v453_v41 = vpack.c.bf16 %v446_v34, %v445_v38  ;;  %v447_v44 = vmul.f32 %v2353_v32, %v434_v33 }
 0x213   :  { %v436_v30 = vpop.permute.xlu1 %435 }
 0x214   :  { %563 = vmatpush1.bf16.msra.mxu1 %v421_v25  ;;  %v448_v42 = vmul.f32 %v2353_v32, %v436_v30 }
 0x215   :  { %564 = vmatprep.subr.bf16.mxu1 %v2063_v0  ;;  %v438_v43 = vpop.permute.xlu0 %437 }
 0x216   :  { %v454_v45 = vpack.c.bf16 %v448_v42, %v447_v44  ;;  %v449_v49 = vmul.f32 %v2353_v32, %v438_v43 }
 0x217   :  { %v440_v39 = vpop.permute.xlu1 %439 }
 0x218   :  { %565 = vmatpush1.bf16.msra.mxu1 %v422_v27  ;;  %v450_v47 = vmul.f32 %v2353_v32, %v440_v39 }
 0x219   :  { %566 = vmatprep.subr.bf16.mxu1 %v2063_v0  ;;  %v442_v53 = vpop.permute.xlu0 %441 }
 0x21a   :  { %v455_v55 = vpack.c.bf16 %v450_v47, %v449_v49  ;;  %v451_v57 = vmul.f32 %v2353_v32, %v442_v53 }
 0x21b   :  { %v444_v48 = vpop.permute.xlu1 %443 }
 0x21c   :  { %567 = vmatpush1.bf16.msra.mxu1 %v423_v29  ;;  %v452_v56 = vmul.f32 %v2353_v32, %v444_v48 }
 0x21d   :  { %568 = vmatprep.subr.bf16.mxu1 %v2063_v0 }
 0x21e   :  { %v456_v58 = vpack.c.bf16 %v452_v56, %v451_v57 }
 0x220   :  { %569 = vmatpush1.bf16.msra.mxu1 %v424_v36 }
 0x221   :  { %570 = vmatprep.subr.bf16.mxu1 %v2063_v0 }
 0x224   :  { %571 = vmatpush1.bf16.msra.mxu1 %v453_v41 }
 0x225   :  { %572 = vmatprep.subr.bf16.mxu1 %v2063_v0 }
 0x228   :  { %573 = vmatpush1.bf16.msra.mxu1 %v454_v45 }
 0x229   :  { %574 = vmatprep.subr.bf16.mxu1 %v2063_v0 }
 0x22a   :  { %v475_v4 = vpop.permute.xlu0 %474 }
 0x22c   :  { %575 = vmatpush1.bf16.msra.mxu1 %v455_v55  ;;  %v479_v6 = vpop.permute.xlu1 %478 }
 0x22d   :  { %576 = vmatprep.subr.bf16.mxu1 %v2063_v0 }
 0x22e   :  { %v487_v26 = vpop.permute.xlu0 %486 }
 0x230   :  { %577 = vmatpush1.bf16.msra.mxu1 %v456_v58  ;;  %v483_v22 = vpop.permute.xlu1 %482 }
 0x231   :  { %1185 = vmatprep.subr.bf16.mxu1 %v2063_v0 }
 0x232   :  { %v495_v45 = vpop.permute.xlu0 %494 }
 0x233   :  { %587 = vmatmul.mubr.bf16.vlgmr.msra.gmra.mrb[0].mxu1 %v1737_v60 }
 0x234   :  { %1613 = vmatprep.mubr.msk.bf16.mxu1 %vm541_vm0, %v1740_v61  ;;  %v491_v38 = vpop.permute.xlu1 %490 }
 0x238   :  { %v499_v58 = vpop.permute.xlu1 %498 }
 0x23b   :  { %595 = vmatmul.mubr.bf16.gmra.mrb[4].mxu1 %v1742_v62 }
 0x23c   :  { %1614 = vmatprep.mubr.msk.bf16.mxu1 %vm541_vm0, %v1743_v63 }
 0x243   :  { %603 = vmatmul.mubr.bf16.gmra.mrb[8].mxu1 %v1745_v1 }
 0x244   :  { %1615 = vmatprep.mubr.msk.bf16.mxu1 %vm541_vm0, %v1746_v2  ;;  %v503_v2 = vpop.permute.xlu0 %502 }
 0x24b   :  { %611 = vmatmul.mubr.bf16.gmra.mrb[12].mxu1 %v1748_v3 }
 0x306   :  { %v588_v5 = vpop.f32.mrb[0].mxu1 }
 0x307   :  { %v589_v9 = vadd.f32 %v588_v5, %v475_v4  ;;  %v590_v14 = vpop.f32.mrb[1].mxu1 }
 0x308   :  { %v591_v17 = vpop.f32.mrb[2].mxu1 }
 0x309   :  { %v1616_v18 = vmul.f32 -1.442695, %v589_v9  ;;  %v592_v19 = vadd.f32 %v591_v17, %v479_v6  ;;  %v593_v20 = vpop.f32.mrb[3].mxu1 }
 0x30b   :  { %1773 = vpow2.f32 %v1616_v18  ;;  %v1617_v21 = vmul.f32 -1.442695, %v592_v19 }
 0x30d   :  { %1775 = vpow2.f32 %v1617_v21 }
 0x30e   :  { %v596_v23 = vpop.f32.mrb[4].mxu1 }
 0x30f   :  { %v597_v24 = vadd.f32 %v596_v23, %v483_v22  ;;  %v598_v25 = vpop.f32.mrb[5].mxu1 }
 0x310   :  { %v599_v27 = vpop.f32.mrb[6].mxu1 }
 0x311   :  { %v1618_v28 = vmul.f32 -1.442695, %v597_v24  ;;  %v600_v29 = vadd.f32 %v599_v27, %v487_v26  ;;  %v601_v30 = vpop.f32.mrb[7].mxu1 }
 0x313   :  { %1777 = vpow2.f32 %v1618_v28  ;;  %v1619_v33 = vmul.f32 -1.442695, %v600_v29 }
 0x315   :  { %v1774_v34 = vpop.eup %1773  ;;  %1779 = vpow2.f32 %v1619_v33 }
 0x316   :  { %v643_v36 = vadd.f32 1.0, %v1774_v34  ;;  %v604_v39 = vpop.f32.mrb[8].mxu1 }
 0x317   :  { %v1776_v41 = vpop.eup %1775  ;;  %v605_v42 = vadd.f32 %v604_v39, %v491_v38  ;;  %v606_v43 = vpop.f32.mrb[9].mxu1 }
 0x318   :  { %1781 = vrcp.f32 %v643_v36  ;;  %v644_v44 = vadd.f32 1.0, %v1776_v41  ;;  %v607_v47 = vpop.f32.mrb[10].mxu1 }
 0x319   :  { %v1620_v48 = vmul.f32 -1.442695, %v605_v42  ;;  %v608_v49 = vadd.f32 %v607_v47, %v495_v45  ;;  %v609_v53 = vpop.f32.mrb[11].mxu1 }
 0x31a   :  { %1783 = vrcp.f32 %v644_v44 }
 0x31b   :  { %1785 = vpow2.f32 %v1620_v48  ;;  %v1621_v55 = vmul.f32 -1.442695, %v608_v49 }
 0x31d   :  { %v1778_v56 = vpop.eup %1777  ;;  %1787 = vpow2.f32 %v1621_v55 }
 0x31e   :  { %v645_v57 = vadd.f32 1.0, %v1778_v56  ;;  %v612_v60 = vpop.f32.mrb[12].mxu1 }
 0x31f   :  { %v1780_v61 = vpop.eup %1779  ;;  %v613_v62 = vadd.f32 %v612_v60, %v499_v58  ;;  %v614_v63 = vpop.f32.mrb[13].mxu1 }
 0x320   :  { %1789 = vrcp.f32 %v645_v57  ;;  %v646_v1 = vadd.f32 1.0, %v1780_v61  ;;  %v615_v3 = vpop.f32.mrb[14].mxu1 }
 0x321   :  { %v1622_v4 = vmul.f32 -1.442695, %v613_v62  ;;  %v616_v5 = vadd.f32 %v615_v3, %v503_v2  ;;  %v617_v6 = vpop.f32.mrb[15].mxu1 }
 0x322   :  { %v1782_v9 = vpop.eup %1781  ;;  %1791 = vrcp.f32 %v646_v1 }
 0x323   :  { %1793 = vpow2.f32 %v1622_v4  ;;  %v1623_v14 = vmul.f32 -1.442695, %v616_v5  ;;  %v667_v17 = vadd.f32 1.0, %v1782_v9 }
 0x324   :  { %v1784_v18 = vpop.eup %1783 }
 0x325   :  { %v1786_v19 = vpop.eup %1785  ;;  %1795 = vpow2.f32 %v1623_v14  ;;  %v2375_v20 = vmul.f32 %v667_v17, %v2272_v31  ;;  %v668_v21 = vadd.f32 1.0, %v1784_v18 }
 0x326   :  { %v647_v22 = vadd.f32 1.0, %v1786_v19 }
 0x327   :  { %v1788_v23 = vpop.eup %1787  ;;  %692 = vrot.lane.b32.xlu1 %v2375_v20, %s2064_s7  ;;  %v2380_v24 = vmul.f32 %v668_v21, %v2274_v35 }
 0x328   :  { %1797 = vrcp.f32 %v647_v22  ;;  %v648_v25 = vadd.f32 1.0, %v1788_v23 }
 0x329   :  { %694 = vrot.lane.b32.xlu0 %v2380_v24, %s2064_s7  ;;  %v724_v26 = vpack.c.bf16 %v2380_v24, %v2375_v20 }
 0x32a   :  { %v1790_v27 = vpop.eup %1789  ;;  %1799 = vrcp.f32 %v648_v25 }
 0x32b   :  { %v669_v31 = vadd.f32 1.0, %v1790_v27 }
 0x32c   :  { %v1792_v28 = vpop.eup %1791 }
 0x32d   :  { %v1794_v29 = vpop.eup %1793  ;;  %v2387_v30 = vmul.f32 %v669_v31, %v2278_v37  ;;  %v670_v33 = vadd.f32 1.0, %v1792_v28 }
 0x32e   :  { %v649_v34 = vadd.f32 1.0, %v1794_v29 }
 0x32f   :  { %v1796_v35 = vpop.eup %1795  ;;  %696 = vrot.lane.b32.xlu1 %v2387_v30, %s2064_s7  ;;  %v2392_v36 = vmul.f32 %v670_v33, %v2282_v40 }
 0x330   :  { %1801 = vrcp.f32 %v649_v34  ;;  %v650_v38 = vadd.f32 1.0, %v1796_v35 }
 0x331   :  { %698 = vrot.lane.b32.xlu0 %v2392_v36, %s2064_s7  ;;  %v725_v39 = vpack.c.bf16 %v2392_v36, %v2387_v30 }
 0x332   :  { %v1798_v41 = vpop.eup %1797  ;;  %1803 = vrcp.f32 %v650_v38 }
 0x333   :  { %v671_v37 = vadd.f32 1.0, %v1798_v41 }
 0x334   :  { %v1800_v42 = vpop.eup %1799 }
 0x335   :  { %v679_v43 = vmul.f32 %v671_v37, %v2286_v46  ;;  %v672_v44 = vadd.f32 1.0, %v1800_v42 }
 0x337   :  { %700 = vrot.lane.b32.xlu1 %v679_v43, %s2064_s7  ;;  %v680_v40 = vmul.f32 %v672_v44, %v2290_v50  ;;  %v1751_v50 = vld [vmem:[#allocation9 + $0x44] ss:$8 sps:$4 sm:$0xff]   ;;  %v1752_v44 = vld [vmem:[#allocation9 + $0x54] ss:$8 sps:$4 sm:$0xff]  }
 0x338   :  { %1632 = vmatprep.mubr.msk.bf16.mxu0 %vm541_vm0, %v1751_v50 }
 0x339   :  { %702 = vrot.lane.b32.xlu0 %v680_v40, %s2064_s7  ;;  %v726_v45 = vpack.c.bf16 %v680_v40, %v679_v43 }
 0x33a   :  { %v1802_v47 = vpop.eup %1801 }
 0x33b   :  { %v673_v48 = vadd.f32 1.0, %v1802_v47  ;;  %v1757_v47 = vld [vmem:[#allocation9 + $0x60] ss:$8 sps:$4 sm:$0xff]  }
 0x33c   :  { %v1804_v49 = vpop.eup %1803 }
 0x33d   :  { %v681_v53 = vmul.f32 %v673_v48, %v2294_v51  ;;  %v674_v55 = vadd.f32 1.0, %v1804_v49  ;;  %v1758_v48 = vld [vmem:[#allocation9 + $0x74] ss:$8 sps:$4 sm:$0xff]   ;;  %v1760_v49 = vld [vmem:[#allocation9 + $0x70] ss:$8 sps:$4 sm:$0xff]  }
 0x33f   :  { %704 = vrot.lane.b32.xlu1 %v681_v53, %s2064_s7  ;;  %v682_v56 = vmul.f32 %v674_v55, %v2298_v52 }
 0x341   :  { %706 = vrot.lane.b32.xlu0 %v682_v56, %s2064_s7  ;;  %v727_v46 = vpack.c.bf16 %v682_v56, %v681_v53 }
 0x343   :  { %732 = vrot.lane.b32.xlu1 %v2375_v20, %s2065_s10 }
 0x345   :  { %734 = vrot.lane.b32.xlu0 %v2380_v24, %s2065_s10 }
 0x347   :  { %736 = vrot.lane.b32.xlu1 %v2387_v30, %s2065_s10 }
 0x349   :  { %738 = vrot.lane.b32.xlu0 %v2392_v36, %s2065_s10 }
 0x34b   :  { %740 = vrot.lane.b32.xlu1 %v679_v43, %s2065_s10  ;;  %v1749_v43 = vld [vmem:[#allocation9 + $0x40] ss:$8 sps:$4 sm:$0xff]  }
 0x34d   :  { %742 = vrot.lane.b32.xlu0 %v680_v40, %s2065_s10  ;;  %v1754_v40 = vld [vmem:[#allocation9 + $0x50] ss:$8 sps:$4 sm:$0xff]  }
 0x34f   :  { %744 = vrot.lane.b32.xlu1 %v681_v53, %s2065_s10 }
 0x351   :  { %746 = vrot.lane.b32.xlu0 %v682_v56, %s2065_s10 }
 0x399   :  { %v693_v51 = vpop.permute.xlu1 %692 }
 0x39a   :  { %v708_v57 = vmul.f32 %v2331_v59, %v693_v51 }
 0x39b   :  { %v695_v52 = vpop.permute.xlu0 %694 }
 0x39c   :  { %v709_v58 = vmul.f32 %v2331_v59, %v695_v52 }
 0x39e   :  { %v716_v60 = vpack.c.bf16 %v709_v58, %v708_v57 }
 0x3a0   :  { %825 = vmatpush1.bf16.msra.mxu0 %v716_v60 }
 0x3a1   :  { %v697_v61 = vpop.permute.xlu1 %696  ;;  %826 = vmatprep.subr.bf16.mxu0 %v2063_v0 }
 0x3a2   :  { %v710_v63 = vmul.f32 %v2331_v59, %v697_v61 }
 0x3a3   :  { %v699_v62 = vpop.permute.xlu0 %698 }
 0x3a4   :  { %v711_v1 = vmul.f32 %v2331_v59, %v699_v62 }
 0x3a6   :  { %v717_v2 = vpack.c.bf16 %v711_v1, %v710_v63 }
 0x3a8   :  { %827 = vmatpush1.bf16.msra.mxu0 %v717_v2 }
 0x3a9   :  { %v701_v3 = vpop.permute.xlu1 %700  ;;  %828 = vmatprep.subr.bf16.mxu0 %v2063_v0 }
 0x3aa   :  { %v712_v5 = vmul.f32 %v2331_v59, %v701_v3 }
 0x3ab   :  { %v703_v4 = vpop.permute.xlu0 %702 }
 0x3ac   :  { %v713_v6 = vmul.f32 %v2331_v59, %v703_v4  ;;  %v2068_v4 = vmov 3  }
 0x3ad   :  { %1708 = vset.pattern.permute.xlu1 %v2068_v4 }
 0x3ae   :  { %v718_v9 = vpack.c.bf16 %v713_v6, %v712_v5 }
 0x3b0   :  { %829 = vmatpush1.bf16.msra.mxu0 %v718_v9 }
 0x3b1   :  { %v705_v14 = vpop.permute.xlu1 %704  ;;  %830 = vmatprep.subr.bf16.mxu0 %v2063_v0 }
 0x3b2   :  { %v714_v18 = vmul.f32 %v2331_v59, %v705_v14 }
 0x3b3   :  { %v707_v17 = vpop.permute.xlu0 %706 }
 0x3b4   :  { %v715_v19 = vmul.f32 %v2331_v59, %v707_v17 }
 0x3b5   :  { %v733_v23 = vpop.permute.xlu1 %732 }
 0x3b6   :  { %v719_v21 = vpack.c.bf16 %v715_v19, %v714_v18  ;;  %v748_v28 = vmul.f32 %v2353_v32, %v733_v23 }
 0x3b7   :  { %v735_v22 = vpop.permute.xlu0 %734 }
 0x3b8   :  { %831 = vmatpush1.bf16.msra.mxu0 %v719_v21  ;;  %v749_v31 = vmul.f32 %v2353_v32, %v735_v22 }
 0x3b9   :  { %832 = vmatprep.subr.bf16.mxu0 %v2063_v0  ;;  %v737_v27 = vpop.permute.xlu1 %736 }
 0x3ba   :  { %v756_v20 = vpack.c.bf16 %v749_v31, %v748_v28  ;;  %v750_v30 = vmul.f32 %v2353_v32, %v737_v27 }
 0x3bb   :  { %v739_v25 = vpop.permute.xlu0 %738 }
 0x3bc   :  { %833 = vmatpush1.bf16.msra.mxu0 %v724_v26  ;;  %v751_v24 = vmul.f32 %v2353_v32, %v739_v25 }
 0x3bd   :  { %834 = vmatprep.subr.bf16.mxu0 %v2063_v0  ;;  %v741_v26 = vpop.permute.xlu1 %740 }
 0x3be   :  { %v757_v33 = vpack.c.bf16 %v751_v24, %v750_v30  ;;  %v752_v36 = vmul.f32 %v2353_v32, %v741_v26 }
 0x3bf   :  { %v743_v29 = vpop.permute.xlu0 %742 }
 0x3c0   :  { %835 = vmatpush1.bf16.msra.mxu0 %v725_v39  ;;  %v753_v34 = vmul.f32 %v2353_v32, %v743_v29 }
 0x3c1   :  { %836 = vmatprep.subr.bf16.mxu0 %v2063_v0  ;;  %v745_v38 = vpop.permute.xlu1 %744 }
 0x3c2   :  { %v758_v39 = vpack.c.bf16 %v753_v34, %v752_v36  ;;  %v754_v37 = vmul.f32 %v2353_v32, %v745_v38 }
 0x3c3   :  { %v747_v35 = vpop.permute.xlu0 %746 }
 0x3c4   :  { %837 = vmatpush1.bf16.msra.mxu0 %v726_v45  ;;  %v755_v41 = vmul.f32 %v2353_v32, %v747_v35  ;;  %v1755_v45 = vld [vmem:[#allocation9 + $0x64] ss:$8 sps:$4 sm:$0xff]  }
 0x3c5   :  { %838 = vmatprep.subr.bf16.mxu0 %v2063_v0 }
 0x3c6   :  { %v759_v42 = vpack.c.bf16 %v755_v41, %v754_v37 }
 0x3c8   :  { %839 = vmatpush1.bf16.msra.mxu0 %v727_v46 }
 0x3c9   :  { %840 = vmatprep.subr.bf16.mxu0 %v2063_v0 }
 0x3cc   :  { %841 = vmatpush1.bf16.msra.mxu0 %v756_v20 }
 0x3cd   :  { %842 = vmatprep.subr.bf16.mxu0 %v2063_v0 }
 0x3d0   :  { %843 = vmatpush1.bf16.msra.mxu0 %v757_v33 }
 0x3d1   :  { %844 = vmatprep.subr.bf16.mxu0 %v2063_v0 }
 0x3d4   :  { %845 = vmatpush1.bf16.msra.mxu0 %v758_v39 }
 0x3d5   :  { %846 = vmatprep.subr.bf16.mxu0 %v2063_v0 }
 0x3d8   :  { %847 = vmatpush1.bf16.msra.mxu0 %v759_v42 }
 0x3d9   :  { %1424 = vmatprep.subr.bf16.mxu0 %v2063_v0 }
 0x3db   :  { %857 = vmatmul.mubr.bf16.vlgmr.msra.gmra.mrb[8].mxu0 %v1749_v43 }
 0x3dc   :  { %1633 = vmatprep.mubr.msk.bf16.mxu0 %vm541_vm0, %v1752_v44 }
 0x3e3   :  { %865 = vmatmul.mubr.bf16.gmra.mrb[12].mxu0 %v1754_v40 }
 0x3e4   :  { %1634 = vmatprep.mubr.msk.bf16.mxu0 %vm541_vm0, %v1755_v45 }
 0x3eb   :  { %873 = vmatmul.mubr.bf16.gmra.mrb[16].mxu0 %v1757_v47  ;;  %v2069_v47 = vmov 2  }
 0x3ec   :  { %1635 = vmatprep.mubr.msk.bf16.mxu0 %vm541_vm0, %v1758_v48  ;;  %1709 = vset.pattern.permute.xlu0 %v2069_v47 }
 0x3f3   :  { %881 = vmatmul.mubr.bf16.gmra.mrb[20].mxu0 %v1760_v49 }
 0x4ae   :  { %v858_v53 = vpop.f32.mrb[8].mxu0 }
 0x4af   :  { %889 = vadd.xlane.f32.xlu1 %v858_v53  ;;  %v860_v55 = vpop.f32.mrb[9].mxu0 }
 0x4b0   :  { %v861_v56 = vpop.f32.mrb[10].mxu0 }
 0x4b1   :  { %891 = vadd.xlane.f32.xlu0 %v861_v56  ;;  %v863_v46 = vpop.f32.mrb[11].mxu0 }
 0x4b6   :  { %v866_v50 = vpop.f32.mrb[12].mxu0 }
 0x4b7   :  { %893 = vadd.xlane.f32.xlu0 %v866_v50  ;;  %v868_v51 = vpop.f32.mrb[13].mxu0 }
 0x4b8   :  { %v869_v52 = vpop.f32.mrb[14].mxu0 }
 0x4b9   :  { %895 = vadd.xlane.f32.xlu1 %v869_v52  ;;  %v871_v57 = vpop.f32.mrb[15].mxu0 }
 0x4be   :  { %v874_v58 = vpop.f32.mrb[16].mxu0 }
 0x4bf   :  { %897 = vadd.xlane.f32.xlu0 %v874_v58  ;;  %v876_v60 = vpop.f32.mrb[17].mxu0 }
 0x4c0   :  { %v877_v61 = vpop.f32.mrb[18].mxu0 }
 0x4c1   :  { %899 = vadd.xlane.f32.xlu1 %v877_v61  ;;  %v879_v62 = vpop.f32.mrb[19].mxu0 }
 0x4c6   :  { %v882_v63 = vpop.f32.mrb[20].mxu0 }
 0x4c7   :  { %901 = vadd.xlane.f32.xlu0 %v882_v63  ;;  %v884_v1 = vpop.f32.mrb[21].mxu0 }
 0x4c8   :  { %v885_v2 = vpop.f32.mrb[22].mxu0 }
 0x4c9   :  { %903 = vadd.xlane.f32.xlu1 %v885_v2  ;;  %v887_v3 = vpop.f32.mrb[23].mxu0 }
 0x53c   :  { %v890_v5 = vpop.xlane.xlu1 %889 }
 0x53d   :  { %v905_v6 = vmul.f32 0.0078125, %v890_v5 }
 0x53e   :  { %v892_v9 = vpop.xlane.xlu0 %891 }
 0x53f   :  { %v906_v14 = vmul.f32 0.0078125, %v892_v9  ;;  %v2454_v17 = vsub.f32 %v858_v53, %v905_v6 }
 0x541   :  { %v2456_v18 = vsub.f32 %v861_v56, %v906_v14  ;;  %v921_v19 = vmul.f32 %v2454_v17, %v2454_v17  ;;  %v1837_v14 = vld [vmem:[#allocation14 + $0x10] sm:$0xff] }
 0x543   :  { %929 = vadd.xlane.f32.xlu0 %v921_v19  ;;  %v922_v21 = vmul.f32 %v2456_v18, %v2456_v18 }
 0x544   :  { %v894_v22 = vpop.xlane.xlu0 %893 }
 0x545   :  { %v907_v23 = vmul.f32 0.0078125, %v894_v22  ;;  %931 = vadd.xlane.f32.xlu1 %v922_v21 }
 0x546   :  { %v896_v25 = vpop.xlane.xlu1 %895 }
 0x547   :  { %v2462_v27 = vsub.f32 %v866_v50, %v907_v23  ;;  %v908_v31 = vmul.f32 0.0078125, %v896_v25  ;;  %v1838_v25 = vld [vmem:[#allocation14 + $0x18] sm:$0xff] }
 0x549   :  { %v923_v28 = vmul.f32 %v2462_v27, %v2462_v27  ;;  %v2466_v29 = vsub.f32 %v869_v52, %v908_v31 }
 0x54b   :  { %933 = vadd.xlane.f32.xlu0 %v923_v28  ;;  %v924_v20 = vmul.f32 %v2466_v29, %v2466_v29 }
 0x54c   :  { %v898_v24 = vpop.xlane.xlu0 %897 }
 0x54d   :  { %v909_v26 = vmul.f32 0.0078125, %v898_v24  ;;  %935 = vadd.xlane.f32.xlu1 %v924_v20  ;;  %v1839_v24 = vld [vmem:[#allocation14 + $0x20] sm:$0xff] }
 0x54e   :  { %v900_v30 = vpop.xlane.xlu1 %899 }
 0x54f   :  { %v2470_v33 = vsub.f32 %v874_v58, %v909_v26  ;;  %v910_v34 = vmul.f32 0.0078125, %v900_v30  ;;  %v1840_v30 = vld [vmem:[#allocation14 + $0x28] sm:$0xff] }
 0x551   :  { %v925_v35 = vmul.f32 %v2470_v33, %v2470_v33  ;;  %v2474_v36 = vsub.f32 %v877_v61, %v910_v34 }
 0x553   :  { %937 = vadd.xlane.f32.xlu0 %v925_v35  ;;  %v926_v38 = vmul.f32 %v2474_v36, %v2474_v36 }
 0x554   :  { %v902_v39 = vpop.xlane.xlu0 %901 }
 0x555   :  { %v911_v41 = vmul.f32 0.0078125, %v902_v39  ;;  %939 = vadd.xlane.f32.xlu1 %v926_v38 }
 0x556   :  { %v904_v37 = vpop.xlane.xlu1 %903 }
 0x557   :  { %v2478_v42 = vsub.f32 %v882_v63, %v911_v41  ;;  %v912_v43 = vmul.f32 0.0078125, %v904_v37 }
 0x559   :  { %v927_v44 = vmul.f32 %v2478_v42, %v2478_v42  ;;  %v2482_v40 = vsub.f32 %v885_v2, %v912_v43 }
 0x55b   :  { %941 = vadd.xlane.f32.xlu0 %v927_v44  ;;  %v928_v45 = vmul.f32 %v2482_v40, %v2482_v40 }
 0x55d   :  { %943 = vadd.xlane.f32.xlu1 %v928_v45 }
 0x56e   :  { %1026 = vperm.xlu1 %1708, %v2247_v7  }
 0x572   :  { %1030 = vperm.xlu1 %1708, %v2253_v10  }
 0x576   :  { %1034 = vperm.xlu1 %1708, %v2249_v8  }
 0x57a   :  { %1038 = vperm.xlu1 %1708, %v2255_v11  }
 0x57e   :  { %1042 = vperm.xlu1 %1708, %v2257_v12  }
 0x582   :  { %1711 = vset.pattern.permute.xlu1 %v2069_v47 }
 0x5d0   :  { %v930_v48 = vpop.xlane.xlu0 %929 }
 0x5d1   :  { %v945_v49 = vmul.f32 0.0078125, %v930_v48 }
 0x5d2   :  { %v932_v53 = vpop.xlane.xlu1 %931 }
 0x5d3   :  { %v953_v55 = vadd.f32 1e-05, %v945_v49  ;;  %v946_v56 = vmul.f32 0.0078125, %v932_v53 }
 0x5d5   :  { %1805 = vrsqrt.f32 %v953_v55  ;;  %v954_v46 = vadd.f32 1e-05, %v946_v56 }
 0x5d7   :  { %1807 = vrsqrt.f32 %v954_v46 }
 0x5d8   :  { %v934_v50 = vpop.xlane.xlu0 %933 }
 0x5d9   :  { %v947_v51 = vmul.f32 0.0078125, %v934_v50 }
 0x5da   :  { %v936_v52 = vpop.xlane.xlu1 %935 }
 0x5db   :  { %v955_v57 = vadd.f32 1e-05, %v947_v51  ;;  %v948_v58 = vmul.f32 0.0078125, %v936_v52 }
 0x5dd   :  { %1809 = vrsqrt.f32 %v955_v57  ;;  %v956_v8 = vadd.f32 1e-05, %v948_v58 }
 0x5df   :  { %v1806_v11 = vpop.eup %1805  ;;  %1811 = vrsqrt.f32 %v956_v8 }
 0x5e0   :  { %v938_v12 = vpop.xlane.xlu0 %937  ;;  %v969_v60 = vmul.f32 %v1806_v11, %v2247_v7 }
 0x5e1   :  { %v1808_v61 = vpop.eup %1807  ;;  %v949_v62 = vmul.f32 0.0078125, %v938_v12 }
 0x5e2   :  { %979 = vperm.xlu0 %1709, %v969_v60   ;;  %v940_v63 = vpop.xlane.xlu1 %939  ;;  %v970_v1 = vmul.f32 %v1808_v61, %v2253_v10 }
 0x5e3   :  { %v957_v2 = vadd.f32 1e-05, %v949_v62  ;;  %v950_v3 = vmul.f32 0.0078125, %v940_v63 }
 0x5e4   :  { %984 = vperm.xlu1 %1711, %v970_v1  }
 0x5e5   :  { %1813 = vrsqrt.f32 %v957_v2  ;;  %v958_v5 = vadd.f32 1e-05, %v950_v3 }
 0x5e6   :  { %1710 = vset.pattern.permute.xlu0 %v2068_v4 }
 0x5e7   :  { %v1810_v6 = vpop.eup %1809  ;;  %1815 = vrsqrt.f32 %v958_v5  ;;  %1046 = vperm.xlu0 %1710, %v2259_v13  }
 0x5e8   :  { %v942_v9 = vpop.xlane.xlu0 %941  ;;  %v971_v7 = vmul.f32 %v1837_v14, %v1810_v6 }
 0x5e9   :  { %v1812_v19 = vpop.eup %1811  ;;  %v951_v21 = vmul.f32 0.0078125, %v942_v9 }
 0x5ea   :  { %989 = vperm.xlu1 %1711, %v971_v7   ;;  %v944_v22 = vpop.xlane.xlu1 %943  ;;  %v972_v31 = vmul.f32 %v1838_v25, %v1812_v19 }
 0x5eb   :  { %v959_v23 = vadd.f32 1e-05, %v951_v21  ;;  %v952_v10 = vmul.f32 0.0078125, %v944_v22  ;;  %1712 = vset.pattern.permute.xlu0 %v2069_v47 }
 0x5ed   :  { %1817 = vrsqrt.f32 %v959_v23  ;;  %v960_v28 = vadd.f32 1e-05, %v952_v10 }
 0x5ee   :  { %994 = vperm.xlu1 %1711, %v972_v31   ;;  %v1027_v37 = vpop.permute.xlu1 %1026 }
 0x5ef   :  { %v1814_v20 = vpop.eup %1813  ;;  %1819 = vrsqrt.f32 %v960_v28 }
 0x5f0   :  { %v973_v13 = vmul.f32 %v1839_v24, %v1814_v20 }
 0x5f1   :  { %v1816_v26 = vpop.eup %1815 }
 0x5f2   :  { %999 = vperm.xlu1 %1711, %v973_v13   ;;  %v974_v34 = vmul.f32 %v1840_v30, %v1816_v26  ;;  %v1031_v43 = vpop.permute.xlu1 %1030 }
 0x5f4   :  { %1004 = vperm.xlu0 %1712, %v974_v34  }
 0x5f6   :  { %v1035_v44 = vpop.permute.xlu1 %1034 }
 0x5f7   :  { %v1818_v35 = vpop.eup %1817 }
 0x5f8   :  { %v975_v38 = vmul.f32 %v1818_v35, %v2263_v15  ;;  %1713 = vset.pattern.permute.xlu0 %v2068_v4 }
 0x5f9   :  { %v1820_v39 = vpop.eup %1819  ;;  %1050 = vperm.xlu0 %1713, %v2263_v15  }
 0x5fa   :  { %1009 = vperm.xlu1 %1711, %v975_v38   ;;  %v976_v41 = vmul.f32 %v1820_v39, %v2267_v16  ;;  %v1039_v45 = vpop.permute.xlu1 %1038 }
 0x5fd   :  { %1716 = vset.pattern.permute.xlu0 %v2063_v0 }
 0x5fe   :  { %1014 = vperm.xlu1 %1711, %v976_v41   ;;  %v1043_v48 = vpop.permute.xlu1 %1042 }
 0x602   :  { %1714 = vset.pattern.permute.xlu1 %v2068_v4 }
 0x603   :  { %1054 = vperm.xlu1 %1714, %v2267_v16  }
 0x607   :  { %1715 = vset.pattern.permute.xlu1 %v2063_v0 }
 0x661   :  { %v980_v49 = vpop.permute.xlu0 %979 }
 0x662   :  { %v1017_v15 = vmul.f32 %v980_v49, %v2454_v17 }
 0x663   :  { %v985_v53 = vpop.permute.xlu1 %984 }
 0x664   :  { %v1057_v55 = vadd.f32 %v1027_v37, %v1017_v15  ;;  %v1018_v56 = vmul.f32 %v985_v53, %v2456_v18 }
 0x666   :  { %v2508_v46 = vmax.f32 %v1057_v55, 0.0  ;;  %v1058_v50 = vadd.f32 %v1031_v43, %v1018_v56  ;;  %v1047_v18 = vpop.permute.xlu0 %1046 }
 0x668   :  { %v2510_v51 = vmax.f32 %v1058_v50, 0.0  ;;  %1077 = vrot.lane.b32.xlu0 %v2508_v46, %s2064_s7 }
 0x669   :  { %v990_v16 = vpop.permute.xlu1 %989 }
 0x66a   :  { %v1019_v52 = vmul.f32 %v990_v16, %v2462_v27  ;;  %1079 = vrot.lane.b32.xlu1 %v2510_v51, %s2064_s7  ;;  %v1109_v17 = vpack.c.bf16 %v2510_v51, %v2508_v46 }
 0x66c   :  { %v1059_v57 = vadd.f32 %v1035_v44, %v1019_v52 }
 0x66d   :  { %v995_v58 = vpop.permute.xlu1 %994 }
 0x66e   :  { %v2519_v8 = vmax.f32 %v1059_v57, 0.0  ;;  %v1020_v11 = vmul.f32 %v995_v58, %v2466_v29 }
 0x670   :  { %v1060_v12 = vadd.f32 %v1039_v45, %v1020_v11  ;;  %1081 = vrot.lane.b32.xlu0 %v2519_v8, %s2064_s7 }
 0x671   :  { %v1000_v60 = vpop.permute.xlu1 %999 }
 0x672   :  { %v2524_v61 = vmax.f32 %v1060_v12, 0.0  ;;  %v1021_v27 = vmul.f32 %v1000_v60, %v2470_v33 }
 0x673   :  { %v1005_v62 = vpop.permute.xlu0 %1004 }
 0x674   :  { %v1061_v63 = vadd.f32 %v1043_v48, %v1021_v27  ;;  %v1022_v1 = vmul.f32 %v1005_v62, %v2474_v36  ;;  %1083 = vrot.lane.b32.xlu1 %v2524_v61, %s2064_s7  ;;  %v1110_v2 = vpack.c.bf16 %v2524_v61, %v2519_v8 }
 0x676   :  { %v2532_v29 = vmax.f32 %v1061_v63, 0.0  ;;  %v1062_v3 = vadd.f32 %v1047_v18, %v1022_v1  ;;  %v1761_v1 = vld [vmem:[#allocation11] ss:$8 sps:$4 sm:$0xff]  }
 0x678   :  { %v1070_v5 = vmax.f32 %v1062_v3, 0.0  ;;  %1085 = vrot.lane.b32.xlu0 %v2532_v29, %s2064_s7  ;;  %v1051_v9 = vpop.permute.xlu0 %1050 }
 0x679   :  { %v1010_v6 = vpop.permute.xlu1 %1009 }
 0x67a   :  { %v1023_v33 = vmul.f32 %v1010_v6, %v2478_v42  ;;  %1087 = vrot.lane.b32.xlu1 %v1070_v5, %s2064_s7  ;;  %v1111_v36 = vpack.c.bf16 %v1070_v5, %v2532_v29  ;;  %v1763_v42 = vld [vmem:[#allocation11 + $0x4] ss:$8 sps:$4 sm:$0xff]  }
 0x67b   :  { %1640 = vmatprep.mubr.msk.bf16.mxu1 %vm541_vm0, %v1763_v42 }
 0x67c   :  { %v1063_v14 = vadd.f32 %v1051_v9, %v1023_v33 }
 0x67d   :  { %v1015_v7 = vpop.permute.xlu1 %1014 }
 0x67e   :  { %v1071_v19 = vmax.f32 %v1063_v14, 0.0  ;;  %v1024_v21 = vmul.f32 %v1015_v7, %v2482_v40 }
 0x680   :  { %1089 = vrot.lane.b32.xlu0 %v1071_v19, %s2064_s7 }
 0x682   :  { %v1055_v22 = vpop.permute.xlu1 %1054 }
 0x683   :  { %v1064_v23 = vadd.f32 %v1055_v22, %v1024_v21 }
 0x684   :  { %1117 = vrot.lane.b32.xlu0 %v2508_v46, %s2065_s10 }
 0x685   :  { %v1072_v10 = vmax.f32 %v1064_v23, 0.0 }
 0x687   :  { %v1112_v25 = vpack.c.bf16 %v1072_v10, %v1071_v19  ;;  %1091 = vrot.lane.b32.xlu1 %v1072_v10, %s2064_s7 }
 0x688   :  { %1121 = vrot.lane.b32.xlu0 %v2519_v8, %s2065_s10 }
 0x68b   :  { %1119 = vrot.lane.b32.xlu1 %v2510_v51, %s2065_s10 }
 0x68c   :  { %1125 = vrot.lane.b32.xlu0 %v2532_v29, %s2065_s10  ;;  %v1766_v29 = vld [vmem:[#allocation11 + $0x10] ss:$8 sps:$4 sm:$0xff]  }
 0x68f   :  { %1123 = vrot.lane.b32.xlu1 %v2524_v61, %s2065_s10 }
 0x690   :  { %1129 = vrot.lane.b32.xlu0 %v1071_v19, %s2065_s10 }
 0x693   :  { %1127 = vrot.lane.b32.xlu1 %v1070_v5, %s2065_s10 }
 0x697   :  { %1131 = vrot.lane.b32.xlu1 %v1072_v10, %s2065_s10 }
 0x6da   :  { %v1078_v40 = vpop.permute.xlu0 %1077 }
 0x6db   :  { %v1093_v28 = vmul.f32 %v2331_v59, %v1078_v40 }
 0x6dc   :  { %v1080_v31 = vpop.permute.xlu1 %1079 }
 0x6dd   :  { %v1094_v20 = vmul.f32 %v2331_v59, %v1080_v31 }
 0x6df   :  { %v1101_v24 = vpack.c.bf16 %v1094_v20, %v1093_v28 }
 0x6e1   :  { %1186 = vmatpush1.bf16.msra.mxu1 %v1101_v24 }
 0x6e2   :  { %1187 = vmatprep.subr.bf16.mxu1 %v2063_v0  ;;  %v1082_v13 = vpop.permute.xlu0 %1081 }
 0x6e3   :  { %v1095_v30 = vmul.f32 %v2331_v59, %v1082_v13 }
 0x6e6   :  { %v1084_v26 = vpop.permute.xlu1 %1083 }
 0x6e7   :  { %v1096_v34 = vmul.f32 %v2331_v59, %v1084_v26 }
 0x6e9   :  { %v1102_v35 = vpack.c.bf16 %v1096_v34, %v1095_v30 }
 0x6ea   :  { %v1086_v38 = vpop.permute.xlu0 %1085 }
 0x6eb   :  { %1188 = vmatpush1.bf16.msra.mxu1 %v1102_v35  ;;  %v1097_v41 = vmul.f32 %v2331_v59, %v1086_v38 }
 0x6ec   :  { %v1088_v39 = vpop.permute.xlu1 %1087  ;;  %1189 = vmatprep.subr.bf16.mxu1 %v2063_v0 }
 0x6ed   :  { %v1098_v37 = vmul.f32 %v2331_v59, %v1088_v39 }
 0x6ef   :  { %v1103_v43 = vpack.c.bf16 %v1098_v37, %v1097_v41 }
 0x6f1   :  { %1190 = vmatpush1.bf16.msra.mxu1 %v1103_v43 }
 0x6f2   :  { %1191 = vmatprep.subr.bf16.mxu1 %v2063_v0  ;;  %v1090_v44 = vpop.permute.xlu0 %1089 }
 0x6f3   :  { %v1099_v48 = vmul.f32 %v2331_v59, %v1090_v44 }
 0x6f6   :  { %v1118_v55 = vpop.permute.xlu0 %1117 }
 0x6f7   :  { %v1133_v52 = vmul.f32 %v2353_v32, %v1118_v55 }
 0x6f9   :  { %v1092_v45 = vpop.permute.xlu1 %1091 }
 0x6fa   :  { %v1100_v49 = vmul.f32 %v2331_v59, %v1092_v45  ;;  %v1122_v50 = vpop.permute.xlu0 %1121 }
 0x6fb   :  { %v1135_v58 = vmul.f32 %v2353_v32, %v1122_v50 }
 0x6fc   :  { %v1104_v15 = vpack.c.bf16 %v1100_v49, %v1099_v48  ;;  %v2595_v48 = vld [vmem:[#allocation15] sm:$0xff] }
 0x6fd   :  { %v1120_v53 = vpop.permute.xlu1 %1119 }
 0x6fe   :  { %1192 = vmatpush1.bf16.msra.mxu1 %v1104_v15  ;;  %v1134_v16 = vmul.f32 %v2353_v32, %v1120_v53  ;;  %v2597_v53 = vld [vmem:[#allocation15 + $0x8] sm:$0xff] }
 0x6ff   :  { %1193 = vmatprep.subr.bf16.mxu1 %v2063_v0 }
 0x700   :  { %v1141_v46 = vpack.c.bf16 %v1134_v16, %v1133_v52 }
 0x701   :  { %v1124_v56 = vpop.permute.xlu1 %1123 }
 0x702   :  { %1194 = vmatpush1.bf16.msra.mxu1 %v1109_v17  ;;  %v1136_v51 = vmul.f32 %v2353_v32, %v1124_v56  ;;  %v1126_v17 = vpop.permute.xlu0 %1125 }
 0x703   :  { %1195 = vmatprep.subr.bf16.mxu1 %v2063_v0  ;;  %v1137_v12 = vmul.f32 %v2353_v32, %v1126_v17 }
 0x704   :  { %v1142_v18 = vpack.c.bf16 %v1136_v51, %v1135_v58 }
 0x705   :  { %v1128_v57 = vpop.permute.xlu1 %1127 }
 0x706   :  { %1196 = vmatpush1.bf16.msra.mxu1 %v1110_v2  ;;  %v1138_v8 = vmul.f32 %v2353_v32, %v1128_v57  ;;  %v1130_v60 = vpop.permute.xlu0 %1129  ;;  %v1764_v2 = vld [vmem:[#allocation11 + $0x14] ss:$8 sps:$4 sm:$0xff]  }
 0x707   :  { %1197 = vmatprep.subr.bf16.mxu1 %v2063_v0  ;;  %v1139_v62 = vmul.f32 %v2353_v32, %v1130_v60 }
 0x708   :  { %v1143_v61 = vpack.c.bf16 %v1138_v8, %v1137_v12 }
 0x709   :  { %v1132_v11 = vpop.permute.xlu1 %1131 }
 0x70a   :  { %1198 = vmatpush1.bf16.msra.mxu1 %v1111_v36  ;;  %v1140_v27 = vmul.f32 %v2353_v32, %v1132_v11 }
 0x70b   :  { %1199 = vmatprep.subr.bf16.mxu1 %v2063_v0 }
 0x70c   :  { %v1144_v63 = vpack.c.bf16 %v1140_v27, %v1139_v62 }
 0x70e   :  { %1200 = vmatpush1.bf16.msra.mxu1 %v1112_v25 }
 0x70f   :  { %1201 = vmatprep.subr.bf16.mxu1 %v2063_v0 }
 0x712   :  { %1202 = vmatpush1.bf16.msra.mxu1 %v1141_v46  ;;  %v2605_v46 = vld [vmem:[#allocation15 + $0x10] sm:$0xff] }
 0x713   :  { %1203 = vmatprep.subr.bf16.mxu1 %v2063_v0 }
 0x716   :  { %1204 = vmatpush1.bf16.msra.mxu1 %v1142_v18  ;;  %v2610_v18 = vld [vmem:[#allocation15 + $0x18] sm:$0xff] }
 0x717   :  { %1205 = vmatprep.subr.bf16.mxu1 %v2063_v0 }
 0x71a   :  { %1206 = vmatpush1.bf16.msra.mxu1 %v1143_v61 }
 0x71b   :  { %1207 = vmatprep.subr.bf16.mxu1 %v2063_v0 }
 0x71e   :  { %1208 = vmatpush1.bf16.msra.mxu1 %v1144_v63 }
 0x721   :  { %1218 = vmatmul.mubr.bf16.vlgmr.msra.gmra.mrb[16].mxu1 %v1761_v1 }
 0x722   :  { %1641 = vmatprep.mubr.msk.bf16.mxu1 %vm541_vm0, %v1764_v2 }
 0x729   :  { %1226 = vmatmul.mubr.bf16.gmra.mrb[20].mxu1 %v1766_v29 }
 0x7f4   :  { %v1219_v3 = vpop.f32.mrb[16].mxu1 }
 0x7f5   :  { %1234 = vadd.xlane.f32.xlu0 %v1219_v3  ;;  %v1221_v5 = vpop.f32.mrb[17].mxu1 }
 0x7f6   :  { %v1222_v6 = vpop.f32.mrb[18].mxu1 }
 0x7f7   :  { %1236 = vadd.xlane.f32.xlu1 %v1222_v6  ;;  %v1224_v9 = vpop.f32.mrb[19].mxu1 }
 0x7fc   :  { %v1227_v33 = vpop.f32.mrb[20].mxu1 }
 0x7fd   :  { %1238 = vadd.xlane.f32.xlu0 %v1227_v33  ;;  %v1229_v36 = vpop.f32.mrb[21].mxu1 }
 0x7fe   :  { %v1230_v14 = vpop.f32.mrb[22].mxu1 }
 0x7ff   :  { %v1232_v7 = vpop.f32.mrb[23].mxu1 }
 0x800   :  { %v1330_v7 = vld [vmem:[#allocation6] sm:$0xff] }
 0x801   :  { %1240 = vadd.xlane.f32.xlu0 %v1230_v14 }
 0x882   :  { %v1235_v19 = vpop.xlane.xlu0 %1234 }
 0x883   :  { %v1242_v21 = vmul.f32 0.0078125, %v1235_v19 }
 0x884   :  { %v1237_v22 = vpop.xlane.xlu1 %1236 }
 0x885   :  { %v1246_v23 = vsub.f32 %v1219_v3, %v1242_v21  ;;  %v1243_v10 = vmul.f32 0.0078125, %v1237_v22 }
 0x887   :  { %v1247_v25 = vsub.f32 %v1222_v6, %v1243_v10  ;;  %v1250_v42 = vmul.f32 %v1246_v23, %v1246_v23  ;;  %v1331_v10 = vld [vmem:[#allocation6 + $0x8] sm:$0xff] }
 0x889   :  { %1254 = vadd.xlane.f32.xlu1 %v1250_v42  ;;  %v1251_v40 = vmul.f32 %v1247_v25, %v1247_v25 }
 0x88a   :  { %v1239_v31 = vpop.xlane.xlu0 %1238 }
 0x88b   :  { %v1244_v28 = vmul.f32 0.0078125, %v1239_v31  ;;  %1256 = vadd.xlane.f32.xlu0 %v1251_v40 }
 0x88d   :  { %v2587_v20 = vsub.f32 %v1227_v33, %v1244_v28 }
 0x88e   :  { %v1241_v24 = vpop.xlane.xlu0 %1240 }
 0x88f   :  { %v1245_v13 = vmul.f32 0.0078125, %v1241_v24  ;;  %v1252_v26 = vmul.f32 %v2587_v20, %v2587_v20 }
 0x891   :  { %v2591_v30 = vsub.f32 %v1230_v14, %v1245_v13  ;;  %1258 = vadd.xlane.f32.xlu1 %v1252_v26 }
 0x893   :  { %v1253_v34 = vmul.f32 %v2591_v30, %v2591_v30 }
 0x895   :  { %1260 = vadd.xlane.f32.xlu0 %v1253_v34 }
 0x916   :  { %v1255_v35 = vpop.xlane.xlu1 %1254 }
 0x917   :  { %v1262_v38 = vmul.f32 0.0078125, %v1255_v35 }
 0x918   :  { %v1257_v39 = vpop.xlane.xlu0 %1256 }
 0x919   :  { %v1266_v41 = vadd.f32 1e-05, %v1262_v38  ;;  %v1263_v37 = vmul.f32 0.0078125, %v1257_v39 }
 0x91b   :  { %1821 = vrsqrt.f32 %v1266_v41  ;;  %v1267_v43 = vadd.f32 1e-05, %v1263_v37 }
 0x91d   :  { %1823 = vrsqrt.f32 %v1267_v43 }
 0x91e   :  { %v1259_v44 = vpop.xlane.xlu1 %1258 }
 0x91f   :  { %v1264_v45 = vmul.f32 0.0078125, %v1259_v44 }
 0x921   :  { %v1268_v50 = vadd.f32 1e-05, %v1264_v45  ;;  %v1380_v45 = vpack.c.bf16 %v1331_v10, %v1330_v7 }
 0x922   :  { %v1261_v49 = vpop.xlane.xlu0 %1260 }
 0x923   :  { %v1265_v16 = vmul.f32 0.0078125, %v1261_v49  ;;  %1825 = vrsqrt.f32 %v1268_v50 }
 0x925   :  { %v1822_v15 = vpop.eup %1821  ;;  %v1269_v57 = vadd.f32 1e-05, %v1265_v16 }
 0x926   :  { %v1274_v55 = vmul.f32 %v1822_v15, %v2595_v48 }
 0x927   :  { %v1824_v56 = vpop.eup %1823  ;;  %1827 = vrsqrt.f32 %v1269_v57 }
 0x928   :  { %1280 = vperm.xlu1 %1715, %v1274_v55   ;;  %v1275_v52 = vmul.f32 %v1824_v56, %v2597_v53 }
 0x92a   :  { %1285 = vperm.xlu0 %1716, %v1275_v52  }
 0x92c   :  { %1717 = vset.pattern.permute.xlu1 %v2066_v54 }
 0x92d   :  { %1304 = vperm.xlu1 %1717, %v2595_v48   ;;  %v1826_v51 = vpop.eup %1825 }
 0x92e   :  { %1720 = vset.pattern.permute.xlu0 %v2069_v47  ;;  %v1276_v17 = vmul.f32 %v1826_v51, %v2605_v46 }
 0x931   :  { %1309 = vperm.xlu1 %1717, %v2597_v53   ;;  %v1828_v58 = vpop.eup %1827 }
 0x932   :  { %v1277_v8 = vmul.f32 %v1828_v58, %v2610_v18 }
 0x935   :  { %1314 = vperm.xlu1 %1717, %v2605_v46  }
 0x939   :  { %1718 = vset.pattern.permute.xlu1 %v2063_v0 }
 0x93a   :  { %1290 = vperm.xlu1 %1718, %v1276_v17  }
 0x93e   :  { %1295 = vperm.xlu1 %1718, %v1277_v8  }
 0x942   :  { %1719 = vset.pattern.permute.xlu1 %v2066_v54 }
 0x943   :  { %1319 = vperm.xlu1 %1719, %v2610_v18  }
 0x947   :  { %1721 = vset.pattern.permute.xlu1 %v2068_v4 }
 0x9a7   :  { %v1281_v11 = vpop.permute.xlu1 %1280 }
 0x9a8   :  { %v1298_v12 = vmul.f32 %v1281_v11, %v1246_v23  ;;  %v1767_v11 = vld [vmem:[#allocation12] ss:$8 sps:$4 sm:$0xff]  }
 0x9a9   :  { %v1286_v60 = vpop.permute.xlu0 %1285 }
 0x9aa   :  { %v1299_v62 = vmul.f32 %v1286_v60, %v1247_v25  ;;  %v1769_v25 = vld [vmem:[#allocation12 + $0x4] ss:$8 sps:$4 sm:$0xff]   ;;  %v1772_v60 = vld [vmem:[#allocation12 + $0x10] ss:$8 sps:$4 sm:$0xff]  }
 0x9ab   :  { %1646 = vmatprep.mubr.msk.bf16.mxu0 %vm1417_vm3, %v1769_v25 }
 0x9ac   :  { %v1305_v61 = vpop.permute.xlu1 %1304 }
 0x9ad   :  { %v1322_v27 = vadd.f32 %v1305_v61, %v1298_v12  ;;  %v1770_v12 = vld [vmem:[#allocation12 + $0x14] ss:$8 sps:$4 sm:$0xff]  }
 0x9af   :  { %v1326_v63 = vmax.f32 %v1322_v27, 0.0 }
 0x9b0   :  { %v1310_v1 = vpop.permute.xlu1 %1309 }
 0x9b1   :  { %v1323_v2 = vadd.f32 %v1310_v1, %v1299_v62  ;;  %1336 = vrot.lane.b32.xlu1 %v1326_v63, %s2064_s7 }
 0x9b3   :  { %v1327_v29 = vmax.f32 %v1323_v2, 0.0 }
 0x9b4   :  { %v1315_v3 = vpop.permute.xlu1 %1314 }
 0x9b5   :  { %v1352_v5 = vpack.c.bf16 %v1327_v29, %v1326_v63  ;;  %1338 = vrot.lane.b32.xlu0 %v1327_v29, %s2064_s7 }
 0x9b9   :  { %v1291_v54 = vpop.permute.xlu1 %1290 }
 0x9ba   :  { %v1300_v6 = vmul.f32 %v1291_v54, %v2587_v20 }
 0x9bc   :  { %v1324_v9 = vadd.f32 %v1315_v3, %v1300_v6 }
 0x9bd   :  { %v1296_v33 = vpop.permute.xlu1 %1295 }
 0x9be   :  { %v1328_v36 = vmax.f32 %v1324_v9, 0.0  ;;  %v1301_v14 = vmul.f32 %v1296_v33, %v2591_v30 }
 0x9c0   :  { %1340 = vrot.lane.b32.xlu1 %v1328_v36, %s2064_s7 }
 0x9c2   :  { %v1320_v19 = vpop.permute.xlu1 %1319 }
 0x9c3   :  { %v1325_v21 = vadd.f32 %v1320_v19, %v1301_v14 }
 0x9c4   :  { %1372 = vrot.lane.b32.xlu1 %v1330_v7, %s2064_s7 }
 0x9c5   :  { %v1329_v22 = vmax.f32 %v1325_v21, 0.0 }
 0x9c7   :  { %v1353_v23 = vpack.c.bf16 %v1329_v22, %v1328_v36  ;;  %1342 = vrot.lane.b32.xlu0 %v1329_v22, %s2064_s7 }
 0x9c8   :  { %1356 = vrot.lane.b32.xlu1 %v1326_v63, %s2065_s10 }
 0x9cb   :  { %1374 = vrot.lane.b32.xlu0 %v1331_v10, %s2064_s7 }
 0x9cc   :  { %1360 = vrot.lane.b32.xlu1 %v1328_v36, %s2065_s10 }
 0x9cf   :  { %1358 = vrot.lane.b32.xlu0 %v1327_v29, %s2065_s10 }
 0x9d0   :  { %1382 = vrot.lane.b32.xlu1 %v1330_v7, %s2065_s10 }
 0x9d3   :  { %1362 = vrot.lane.b32.xlu0 %v1329_v22, %s2065_s10 }
 0x9d7   :  { %1384 = vrot.lane.b32.xlu0 %v1331_v10, %s2065_s10 }
 0xa23   :  { %v1337_v42 = vpop.permute.xlu1 %1336 }
 0xa24   :  { %v1344_v31 = vmul.f32 %v2331_v59, %v1337_v42 }
 0xa27   :  { %v1339_v40 = vpop.permute.xlu0 %1338 }
 0xa28   :  { %v1345_v28 = vmul.f32 %v2331_v59, %v1339_v40 }
 0xa2a   :  { %v1348_v20 = vpack.c.bf16 %v1345_v28, %v1344_v31 }
 0xa2c   :  { %1425 = vmatpush1.bf16.msra.mxu0 %v1348_v20 }
 0xa2d   :  { %1426 = vmatprep.subr.bf16.mxu0 %v2063_v0 }
 0xa32   :  { %v1341_v24 = vpop.permute.xlu1 %1340 }
 0xa33   :  { %v1346_v26 = vmul.f32 %v2331_v59, %v1341_v24 }
 0xa36   :  { %v1373_v34 = vpop.permute.xlu1 %1372 }
 0xa37   :  { %v1376_v35 = vmul.f32 %v2331_v59, %v1373_v34 }
 0xa39   :  { %v1343_v13 = vpop.permute.xlu0 %1342 }
 0xa3a   :  { %v1347_v30 = vmul.f32 %v2331_v59, %v1343_v13  ;;  %v1357_v43 = vpop.permute.xlu1 %1356 }
 0xa3b   :  { %v1364_v55 = vmul.f32 %v2353_v32, %v1357_v43 }
 0xa3c   :  { %v1349_v38 = vpack.c.bf16 %v1347_v30, %v1346_v26 }
 0xa3d   :  { %v1375_v39 = vpop.permute.xlu0 %1374 }
 0xa3e   :  { %v1377_v41 = vmul.f32 %v2331_v59, %v1375_v39  ;;  %1427 = vmatpush1.bf16.msra.mxu0 %v1349_v38  ;;  %v1361_v49 = vpop.permute.xlu1 %1360 }
 0xa3f   :  { %1428 = vmatprep.subr.bf16.mxu0 %v2063_v0  ;;  %v1366_v57 = vmul.f32 %v2353_v32, %v1361_v49 }
 0xa40   :  { %v1378_v37 = vpack.c.bf16 %v1377_v41, %v1376_v35 }
 0xa41   :  { %v1359_v44 = vpop.permute.xlu0 %1358 }
 0xa42   :  { %1429 = vmatpush1.bf16.msra.mxu0 %v1378_v37  ;;  %v1365_v59 = vmul.f32 %v2353_v32, %v1359_v44  ;;  %v1383_v56 = vpop.permute.xlu1 %1382 }
 0xa43   :  { %1430 = vmatprep.subr.bf16.mxu0 %v2063_v0  ;;  %v1386_v51 = vmul.f32 %v2353_v32, %v1383_v56 }
 0xa44   :  { %v1368_v16 = vpack.c.bf16 %v1365_v59, %v1364_v55 }
 0xa45   :  { %v1363_v15 = vpop.permute.xlu0 %1362 }
 0xa46   :  { %1431 = vmatpush1.bf16.msra.mxu0 %v1352_v5  ;;  %v1367_v52 = vmul.f32 %v2353_v32, %v1363_v15 }
 0xa47   :  { %1432 = vmatprep.subr.bf16.mxu0 %v2063_v0 }
 0xa48   :  { %v1369_v58 = vpack.c.bf16 %v1367_v52, %v1366_v57 }
 0xa49   :  { %v1385_v50 = vpop.permute.xlu0 %1384 }
 0xa4a   :  { %1433 = vmatpush1.bf16.msra.mxu0 %v1353_v23  ;;  %v1387_v17 = vmul.f32 %v2353_v32, %v1385_v50 }
 0xa4b   :  { %1434 = vmatprep.subr.bf16.mxu0 %v2063_v0 }
 0xa4c   :  { %v1388_v8 = vpack.c.bf16 %v1387_v17, %v1386_v51 }
 0xa4e   :  { %1435 = vmatpush1.bf16.msra.mxu0 %v1380_v45 }
 0xa4f   :  { %1436 = vmatprep.subr.bf16.mxu0 %v2063_v0 }
 0xa52   :  { %1437 = vmatpush1.bf16.msra.mxu0 %v1368_v16 }
 0xa53   :  { %1438 = vmatprep.subr.bf16.mxu0 %v2063_v0 }
 0xa56   :  { %1439 = vmatpush1.bf16.msra.mxu0 %v1369_v58 }
 0xa57   :  { %1440 = vmatprep.subr.bf16.mxu0 %v2063_v0 }
 0xa5a   :  { %1441 = vmatpush1.bf16.msra.mxu0 %v1388_v8 }
 0xa5d   :  { %1457 = vmatmul.mubr.bf16.vlgmr.msra.gmra.mrb[24].mxu0 %v1767_v11 }
 0xa5e   :  { %1647 = vmatprep.mubr.msk.bf16.mxu0 %vm1417_vm3, %v1770_v12 }
 0xa65   :  { %1465 = vmatmul.mubr.bf16.gmra.mrb[28].mxu0 %v1772_v60 }
 0xb30   :  { %v1458_v61 = vpop.f32.mrb[24].mxu0 }
 0xb31   :  { %1473 = vadd.xlane.f32.xlu1 %v1458_v61  ;;  %v1460_v27 = vpop.f32.mrb[25].mxu0 }
 0xb32   :  { %v1461_v62 = vpop.f32.mrb[26].mxu0 }
 0xb33   :  { %1475 = vadd.xlane.f32.xlu0 %v1461_v62  ;;  %v1463_v32 = vpop.f32.mrb[27].mxu0 }
 0xb38   :  { %v1466_v63 = vpop.f32.mrb[28].mxu0 }
 0xb39   :  { %1477 = vadd.xlane.f32.xlu0 %v1466_v63  ;;  %v1468_v1 = vpop.f32.mrb[29].mxu0 }
 0xb3a   :  { %v1469_v2 = vpop.f32.mrb[30].mxu0 }
 0xb3b   :  { %1479 = vadd.xlane.f32.xlu1 %v1469_v2  ;;  %v1471_v0 = vpop.f32.mrb[31].mxu0 }
 0xbbe   :  { %v1474_v29 = vpop.xlane.xlu1 %1473 }
 0xbbf   :  { %v1481_v3 = vmul.f32 0.0078125, %v1474_v29 }
 0xbc0   :  { %v1476_v5 = vpop.xlane.xlu0 %1475 }
 0xbc1   :  { %v1485_v54 = vsub.f32 %v1458_v61, %v1481_v3  ;;  %v1482_v6 = vmul.f32 0.0078125, %v1476_v5 }
 0xbc3   :  { %v1486_v9 = vsub.f32 %v1461_v62, %v1482_v6  ;;  %v1489_v33 = vmul.f32 %v1485_v54, %v1485_v54 }
 0xbc5   :  { %1493 = vadd.xlane.f32.xlu0 %v1489_v33  ;;  %v1490_v36 = vmul.f32 %v1486_v9, %v1486_v9 }
 0xbc6   :  { %v1478_v14 = vpop.xlane.xlu0 %1477 }
 0xbc7   :  { %v1483_v7 = vmul.f32 0.0078125, %v1478_v14  ;;  %1495 = vadd.xlane.f32.xlu1 %v1490_v36 }
 0xbc8   :  { %v1480_v19 = vpop.xlane.xlu1 %1479 }
 0xbc9   :  { %v1487_v21 = vsub.f32 %v1466_v63, %v1483_v7  ;;  %v1484_v22 = vmul.f32 0.0078125, %v1480_v19 }
 0xbcb   :  { %v1488_v23 = vsub.f32 %v1469_v2, %v1484_v22  ;;  %v1491_v10 = vmul.f32 %v1487_v21, %v1487_v21 }
 0xbcd   :  { %1497 = vadd.xlane.f32.xlu0 %v1491_v10  ;;  %v1492_v25 = vmul.f32 %v1488_v23, %v1488_v23 }
 0xbcf   :  { %1499 = vadd.xlane.f32.xlu1 %v1492_v25 }
 0xbe0   :  { %1542 = vperm.xlu1 %1721, %v2595_v48  }
 0xbe4   :  { %1546 = vperm.xlu1 %1721, %v2597_v53  }
 0xbe8   :  { %1550 = vperm.xlu1 %1721, %v2605_v46  }
 0xbec   :  { %1722 = vset.pattern.permute.xlu1 %v2069_v47 }
 0xc52   :  { %v1494_v42 = vpop.xlane.xlu0 %1493 }
 0xc53   :  { %v1501_v40 = vmul.f32 0.0078125, %v1494_v42 }
 0xc54   :  { %v1496_v31 = vpop.xlane.xlu1 %1495 }
 0xc55   :  { %v1505_v28 = vadd.f32 1e-05, %v1501_v40  ;;  %v1502_v20 = vmul.f32 0.0078125, %v1496_v31 }
 0xc57   :  { %1829 = vrsqrt.f32 %v1505_v28  ;;  %v1506_v24 = vadd.f32 1e-05, %v1502_v20 }
 0xc59   :  { %1831 = vrsqrt.f32 %v1506_v24 }
 0xc5a   :  { %v1498_v13 = vpop.xlane.xlu0 %1497 }
 0xc5b   :  { %v1503_v26 = vmul.f32 0.0078125, %v1498_v13 }
 0xc5c   :  { %v1500_v30 = vpop.xlane.xlu1 %1499 }
 0xc5d   :  { %v1507_v34 = vadd.f32 1e-05, %v1503_v26  ;;  %v1504_v35 = vmul.f32 0.0078125, %v1500_v30 }
 0xc5f   :  { %1833 = vrsqrt.f32 %v1507_v34  ;;  %v1508_v38 = vadd.f32 1e-05, %v1504_v35 }
 0xc61   :  { %v1830_v39 = vpop.eup %1829  ;;  %1835 = vrsqrt.f32 %v1508_v38 }
 0xc62   :  { %v1513_v41 = vmul.f32 %v1830_v39, %v2595_v48  ;;  %v1543_v48 = vpop.permute.xlu1 %1542 }
 0xc63   :  { %v1832_v47 = vpop.eup %1831 }
 0xc64   :  { %1519 = vperm.xlu0 %1720, %v1513_v41   ;;  %v1514_v37 = vmul.f32 %v1832_v47, %v2597_v53 }
 0xc66   :  { %1524 = vperm.xlu1 %1722, %v1514_v37   ;;  %v1547_v15 = vpop.permute.xlu1 %1546 }
 0xc68   :  { %1724 = vset.pattern.permute.xlu0 %v2068_v4 }
 0xc69   :  { %v1834_v43 = vpop.eup %1833 }
 0xc6a   :  { %v1515_v44 = vmul.f32 %v1834_v43, %v2605_v46  ;;  %v1551_v59 = vpop.permute.xlu1 %1550 }
 0xc6b   :  { %v1836_v45 = vpop.eup %1835 }
 0xc6c   :  { %1529 = vperm.xlu1 %1722, %v1515_v44   ;;  %v1516_v49 = vmul.f32 %v1836_v45, %v2610_v18 }
 0xc70   :  { %1534 = vperm.xlu1 %1722, %v1516_v49  }
 0xc74   :  { %1723 = vset.pattern.permute.xlu1 %v2068_v4 }
 0xc75   :  { %1554 = vperm.xlu1 %1723, %v2610_v18  }
 0xce3   :  { %v1520_v55 = vpop.permute.xlu0 %1519 }
 0xce4   :  { %v1537_v53 = vmul.f32 %v1520_v55, %v1485_v54 }
 0xce5   :  { %v1525_v56 = vpop.permute.xlu1 %1524 }
 0xce6   :  { %v1557_v50 = vadd.f32 %v1543_v48, %v1537_v53  ;;  %v1538_v16 = vmul.f32 %v1525_v56, %v1486_v9 }
 0xce8   :  { %v1561_v52 = vmax.f32 %v1557_v50, 0.0  ;;  %v1558_v57 = vadd.f32 %v1547_v15, %v1538_v16 }
 0xcea   :  { %1565 = vst [vmem:[#allocation17] sm:$0xff] %v1561_v52  ;;  %v1562_v46 = vmax.f32 %v1558_v57, 0.0 }
 0xceb   :  { %v1530_v51 = vpop.permute.xlu1 %1529 }
 0xcec   :  { %1566 = vst [vmem:[#allocation17 + $0x8] sm:$0xff] %v1562_v46  ;;  %v1539_v17 = vmul.f32 %v1530_v51, %v1487_v21 }
 0xcee   :  { %v1559_v58 = vadd.f32 %v1551_v59, %v1539_v17 }
 0xcef   :  { %v1535_v8 = vpop.permute.xlu1 %1534 }
 0xcf0   :  { %v1563_v4 = vmax.f32 %v1559_v58, 0.0  ;;  %v1540_v18 = vmul.f32 %v1535_v8, %v1488_v23 }
 0xcf2   :  { %1567 = vst [vmem:[#allocation17 + $0x10] sm:$0xff] %v1563_v4 }
 0xcf4   :  { %v1555_v11 = vpop.permute.xlu1 %1554 }
 0xcf5   :  { %v1560_v12 = vadd.f32 %v1555_v11, %v1540_v18 }
 0xcf7   :  { %v1564_v60 = vmax.f32 %v1560_v12, 0.0 }
 0xcf9   :  { %1568 = vst [vmem:[#allocation17 + $0x18] sm:$0xff] %v1564_v60 }
 0xcfa   :  { %2028 = shalt.err (!%p2025_p12)
}
 0xcfb   :  { %s2029_s13 = scalar_lea.hbm %s2686_s8, 512 }
 0xcfc   :  { %p2030_p13 = scmp.ne.s32.totalorder %s2686_s8, %s2029_s13  ;;  %p2033_p0 = scmp.lt.u32.totalorder %s2029_s13, %s2686_s8 }
 0xcfe   :  { %p2035_p1 = pnand %p2033_p0, %p2030_p13 }
 0xd00   :  { %2038 = shalt.err (!%p2035_p1)
}
 0xd01   :  { %1580 = dma.vmem_to_hbm [thread:$0]  %s1575_s5, 512, %s2686_s8, [#allocation5], %s2052_s15, %s2052_s15, %s2053_s16  }
 0xd02   :  { %2049 = dma.done.wait [#allocation5], 512  }
 0xd03   :  { %2050 = vsyncadd [#allocation5], 4294966784 }
 0xd04   :  { %1584 = vsyncpa [#allocation4], 1 }
 0xd05   :  { %1585 = vsyncpa [#allocation7], 1 }
 0xd06   :  { %1586 = vsyncpa [#allocation10], 1 }
 0xd07   :  { %1587 = vsyncpa [#allocation13], 1 }
 0xd08   :  { %1588 = vsyncpa [#allocation16], 1 }
 0xd09   :  { %1589 = vsyncpa [#allocation5], 1 }

</bundles_post_ra>
